<compile_context>
chip_gen: v7x
topology: tpu7x:2x2x1
jax: 0.10.0
libtpu: 0.0.40
codegen_flags: <defaults>
</compile_context>

<pallas_src>
import functools

import jax
import jax.numpy as jnp
from jax.experimental import pallas as pl
from jax.experimental.pallas import tpu as pltpu


# ----------------------------- config ---------------------------------------
CFG = dict(
    n_inc=8,      # node feature size
    e_inc=8,      # edge feature size
    u_inc=8,      # global feature size
    w_inc=4,      # winding feature size
    e_outc=16,    # edge output size
    edge_model_mlp1_hidden_sizes=[32, 32],
)

N_INC = CFG["n_inc"]
E_INC = CFG["e_inc"]
U_INC = CFG["u_inc"]
W_INC = CFG["w_inc"]
E_OUTC = CFG["e_outc"]
DIM_IN = E_INC + 2 * N_INC + U_INC                 # 32
DIM_W2 = DIM_IN // 2                               # 16
DIM_H1 = CFG["edge_model_mlp1_hidden_sizes"][0]    # 32
DIM_H2 = CFG["edge_model_mlp1_hidden_sizes"][1]    # 32
DIM_OUT = E_OUTC + DIM_H2                          # 48 (fused output rows)

LN_EPS = 1e-5

# Packed bias / LayerNorm-parameter vector layout (all segments start on a
# multiple of 16 rows -> clean sublane-aligned f32 slices in-kernel).
_BIAS_SEGS = [
    ("bw", DIM_W2), ("gw", DIM_W2), ("bgw", DIM_W2),        # winding_mlp
    ("b1", DIM_H1), ("g1", DIM_H1), ("bg1", DIM_H1),        # mlp1
    ("brz", 2 * DIM_H2), ("bni", DIM_H2), ("bnh", DIM_H2),  # GRU
    ("bx", E_OUTC),                                         # mlp_x
]
BIAS_OFF = {}
_off = 0
for _name, _sz in _BIAS_SEGS:
    BIAS_OFF[_name] = (_off, _off + _sz)
    _off += _sz
BIAS_ROWS = _off                                            # 288


def _round_up(x, m):
    return ((x + m - 1) // m) * m


# ----------------------------- kernel ---------------------------------------
def _layernorm_fm(x, gamma, beta):
    # feature-major: features on sublanes (axis 0), edges on lanes (axis 1).
    mu = jnp.mean(x, axis=0, keepdims=True)
    var = jnp.mean(jnp.square(x - mu), axis=0, keepdims=True)
    return (x - mu) * jax.lax.rsqrt(var + LN_EPS) * gamma + beta


def edge_model_kernel(
    cat_ref, wnd_ref, h_ref,                                 # edge streams
    ww_ref, w1_ref, w1w_ref,                                 # winding_mlp + mlp1
    wrz_ref, wnx_ref, wnh_ref, wx_ref,                       # GRU (+ mlp_x)
    bias_ref,                                                # packed biases/LN (f32)
    out_ref,                                                 # fused f32 output
):
    f32 = jnp.float32
    bf16 = jnp.bfloat16
    H = DIM_H2

    def bseg(name):
        lo, hi = BIAS_OFF[name]
        return bias_ref[lo:hi, :]

    def fdot(w_ref, x):
        # [F_out, F_in] @ [F_in, TE] -> [F_out, TE], f32 MXU accumulation.
        return jnp.dot(w_ref[...], x, preferred_element_type=f32)

    # ---- winding_mlp: Linear + LayerNorm + ReLU ----------------------------
    w = fdot(ww_ref, wnd_ref[...]) + bseg("bw")
    w = jnp.maximum(_layernorm_fm(w, bseg("gw"), bseg("bgw")), 0.0)

    # ---- mlp1 on concat([src, dest, edge_attr, u[batch], w]) ---------------
    # The concat of the four raw streams is pre-fused in the wrapper, so this
    # is one K=32 dot plus one K=16 dot on the in-kernel winding features.
    x = (fdot(w1_ref, cat_ref[...]) + fdot(w1w_ref, w.astype(bf16))
         + bseg("b1"))
    x = jnp.maximum(_layernorm_fm(x, bseg("g1"), bseg("bg1")), 0.0)

    # ---- single-step GRU (PyTorch gate order r, z, n) ----------------------
    # r/z gates come from ONE merged dot on concat([x; h]); h stays f32 for
    # the blend, bf16 only as an MXU operand.
    h = h_ref[...]                                   # [H, TE] f32
    x_bf = x.astype(bf16)
    h_bf = h.astype(bf16)
    xh = jnp.concatenate([x_bf, h_bf], axis=0)       # [H1 + H2, TE] bf16
    rz = fdot(wrz_ref, xh) + bseg("brz")             # [2H, TE] f32
    r = jax.nn.sigmoid(rz[0:H, :])
    z = jax.nn.sigmoid(rz[H:2 * H, :])
    gn = (fdot(wnx_ref, x_bf) + bseg("bni")
          + r * (fdot(wnh_ref, h_bf) + bseg("bnh")))
    n = jnp.tanh(gn)
    h_new = (1.0 - z) * n + z * h                    # f32 recurrent update

    # ---- mlp_x --------------------------------------------------------------
    y = fdot(wx_ref, h_new.astype(bf16)) + bseg("bx")

    # ---- fused lane-dense f32 output store (16/32 row split, 8-aligned) ----
    out_ref[0:E_OUTC, :] = y.astype(out_ref.dtype)
    out_ref[E_OUTC:DIM_OUT, :] = h_new.astype(out_ref.dtype)


# ----------------------------- param packing ---------------------------------
def _pack_params(p):
    """Torch-style params -> 7 bf16 matmul matrices + 1 packed f32 bias vector."""
    f32, bf16 = jnp.float32, jnp.bfloat16
    H = DIM_H2
    wih = p["gru_wih"]
    whh = p["gru_whh"]
    bih = p["gru_bih"].astype(f32)
    bhh = p["gru_bhh"].astype(f32)

    mats = [
        p["w_lin_w"].astype(bf16),                            # ww  [16, 4]
        p["mlp1_w"][:, :DIM_IN].astype(bf16),                 # w1  [32, 32]
        p["mlp1_w"][:, DIM_IN:].astype(bf16),                 # w1w [32, 16]
        jnp.concatenate([wih[:2 * H, :], whh[:2 * H, :]],
                        axis=1).astype(bf16),                 # wrz [64, 64]
        wih[2 * H:, :].astype(bf16),                          # wnx [32, 32]
        whh[2 * H:, :].astype(bf16),                          # wnh [32, 32]
        p["mlpx_w"].astype(bf16),                             # wx  [16, 32]
    ]
    bias_vec = jnp.concatenate([
        p["w_lin_b"], p["w_ln_g"], p["w_ln_b"],
        p["mlp1_b"], p["mlp1_ln_g"], p["mlp1_ln_b"],
        bih[:2 * H] + bhh[:2 * H], bih[2 * H:], bhh[2 * H:],
        p["mlpx_b"],
    ]).astype(f32).reshape(BIAS_ROWS, 1)
    return mats, bias_vec


# ----------------------------- wrapper ---------------------------------------
@functools.partial(jax.jit, static_argnames=("tile_e",))
def recurrent_edge_model(src, dest, edge_attr, h, u, batch, winding, params,
                         tile_e=1024):
    E = src.shape[0]

    # Tile selection: as large as useful, but keep >= 4 grid steps for small E
    # so both v7x TensorCores get work and each still has >=2 steps to pipeline.
    MIN_TILES = 4
    cap = max(128, _round_up(pl.cdiv(E, MIN_TILES), 128))
    te = max(128, min(_round_up(tile_e, 128), cap))
    n_tiles = pl.cdiv(E, te)
    Ep = n_tiles * te
    pad = Ep - E

    bf16, f32 = jnp.bfloat16, jnp.float32

    # TODO(synk): the data-dependent u[batch] gather stays in XLA; an in-kernel
    # version would need scalar prefetch + Element-indexed BlockSpecs.
    u_e = u[batch]                                        # [E, u_inc]

    def prep(x, dtype):
        # [E, F] -> feature-major [F, Ep] (single cast + transpose + pad).
        xt = jnp.transpose(x.astype(dtype))
        if pad:
            xt = jnp.pad(xt, ((0, 0), (0, pad)))
        return xt

    # One fused relayout for the mlp1 concat block (replaces 4 separate ones).
    cat_fm = prep(jnp.concatenate([src, dest, edge_attr, u_e], axis=1), bf16)
    wnd_fm = prep(winding, bf16)                          # [4, Ep]
    h_fm = prep(h, f32)                                   # [32, Ep] recurrent state f32

    mats, bias_vec = _pack_params(params)
    weights = mats + [bias_vec]

    def edge_spec(feat):
        return pl.BlockSpec((feat, te), lambda i: (0, i))

    def weight_spec(shape):
        return pl.BlockSpec(shape, lambda i: (0, 0))

    in_specs = ([edge_spec(DIM_IN), edge_spec(W_INC), edge_spec(DIM_H2)]
                + [weight_spec(w.shape) for w in weights])
    out_specs = pl.BlockSpec((DIM_OUT, te), lambda i: (0, i))

    # Advisory cost estimate so XLA overlaps the gather/relayout ops with us.
    flops = 2 * Ep * (DIM_W2 * W_INC + DIM_H1 * DIM_IN + DIM_H1 * DIM_W2
                      + 2 * DIM_H2 * (DIM_H1 + DIM_H2) + DIM_H2 * DIM_H1
                      + DIM_H2 * DIM_H2 + E_OUTC * DIM_H2)
    bytes_accessed = (Ep * (2 * (DIM_IN + W_INC) + 4 * DIM_H2 + 4 * DIM_OUT)
                      + sum(int(w.size) * w.dtype.itemsize for w in weights))
    transcendentals = Ep * (3 * DIM_H2 + 2)

    out = pl.pallas_call(
        edge_model_kernel,
        out_shape=jax.ShapeDtypeStruct((DIM_OUT, Ep), f32),
        grid_spec=pltpu.PrefetchScalarGridSpec(
            num_scalar_prefetch=0,
            grid=(n_tiles,),
            in_specs=in_specs,
            out_specs=out_specs,
        ),
        compiler_params=pltpu.CompilerParams(
            dimension_semantics=("parallel",)),
        cost_estimate=pl.CostEstimate(
            flops=flops,
            transcendentals=transcendentals,
            bytes_accessed=bytes_accessed),
    )(cat_fm, wnd_fm, h_fm, *weights)

    # Split fused output and restore edges-major layout / true edge count.
    # (Downstream consumers that accept feature-major could skip these.)
    x_out = jnp.transpose(out[:E_OUTC, :E])
    h_out = jnp.transpose(out[E_OUTC:, :E])
    return x_out, h_out


# ----------------------------- reference (f32 math, bf16 weights) ------------
def reference_forward(src, dest, edge_attr, h, u, batch, winding, params):
    f32 = jnp.float32

    def W(k):
        return params[k].astype(f32)

    def ln(x, g, b):
        mu = jnp.mean(x, axis=-1, keepdims=True)
        var = jnp.mean((x - mu) ** 2, axis=-1, keepdims=True)
        return (x - mu) / jnp.sqrt(var + LN_EPS) * g + b

    # winding_mlp
    w = winding @ W("w_lin_w").T + params["w_lin_b"]
    w = jnp.maximum(ln(w, params["w_ln_g"], params["w_ln_b"]), 0.0)

    # mlp1 on concat([src, dest, edge_attr, u[batch], w])
    x_cat = jnp.concatenate([src, dest, edge_attr, u[batch], w], axis=1)
    x = x_cat @ W("mlp1_w").T + params["mlp1_b"]
    x = jnp.maximum(ln(x, params["mlp1_ln_g"], params["mlp1_ln_b"]), 0.0)

    # single-step GRU (r, z, n)
    gi = x @ W("gru_wih").T + params["gru_bih"]
    gh = h @ W("gru_whh").T + params["gru_bhh"]
    H = DIM_H2
    r = jax.nn.sigmoid(gi[:, :H] + gh[:, :H])
    z = jax.nn.sigmoid(gi[:, H:2 * H] + gh[:, H:2 * H])
    n = jnp.tanh(gi[:, 2 * H:] + r * gh[:, 2 * H:])
    h_new = (1.0 - z) * n + z * h

    x_out = h_new @ W("mlpx_w").T + params["mlpx_b"]
    return x_out, h_new


# ----------------------------- params ---------------------------------------
def init_params(key):
    ks = jax.random.split(key, 18)
    s = 0.1
    f32, bf16 = jnp.float32, jnp.bfloat16

    def wm(k, o, i):   # matmul weight, PyTorch [out, in] layout, bf16
        return (s * jax.random.normal(k, (o, i), f32)).astype(bf16)

    def bv(k, o):      # bias, [out], f32
        return s * jax.random.normal(k, (o,), f32)

    def gm(k, o):      # LN gamma ~ 1, f32
        return 1.0 + s * jax.random.normal(k, (o,), f32)

    return {
        # winding_mlp: Linear(w_inc -> dim_w2) + LayerNorm
        "w_lin_w": wm(ks[0], DIM_W2, W_INC),
        "w_lin_b": bv(ks[1], DIM_W2),
        "w_ln_g": gm(ks[2], DIM_W2),
        "w_ln_b": bv(ks[3], DIM_W2),
        # mlp1: Linear(dim_in + dim_w2 -> h1) + LayerNorm
        "mlp1_w": wm(ks[4], DIM_H1, DIM_IN + DIM_W2),
        "mlp1_b": bv(ks[5], DIM_H1),
        "mlp1_ln_g": gm(ks[6], DIM_H1),
        "mlp1_ln_b": bv(ks[7], DIM_H1),
        # GRU(h1 -> h2), PyTorch gate order (r, z, n)
        "gru_wih": wm(ks[8], 3 * DIM_H2, DIM_H1),
        "gru_bih": bv(ks[9], 3 * DIM_H2),
        "gru_whh": wm(ks[10], 3 * DIM_H2, DIM_H2),
        "gru_bhh": bv(ks[11], 3 * DIM_H2),
        # mlp_x: Linear(h2 -> e_outc)
        "mlpx_w": wm(ks[12], E_OUTC, DIM_H2),
        "mlpx_b": bv(ks[13], E_OUTC),
    }


# ----------------------------- main ------------------------------------------
if __name__ == "__main__":
    key = jax.random.PRNGKey(0)
    kp, k1, k2, k3, k4, k5, k6 = jax.random.split(key, 7)

    E = 1000   # deliberately NOT a multiple of the tile -> wrapper pads + crops
    B = 2      # number of graphs

    params = init_params(kp)

    src = jax.random.normal(k1, (E, N_INC), jnp.float32)
    dest = jax.random.normal(k2, (E, N_INC), jnp.float32)
    edge_attr = jax.random.normal(k3, (E, E_INC), jnp.float32)
    h0 = jax.random.normal(k4, (E, DIM_H2), jnp.float32)
    u = jax.random.normal(k5, (B, U_INC), jnp.float32)
    batch = jnp.concatenate([jnp.zeros(E // 2, jnp.int32),
                             jnp.ones(E - E // 2, jnp.int32)])
    winding = jax.random.normal(k6, (E, W_INC), jnp.float32)

    x_out, h_out = recurrent_edge_model(src, dest, edge_attr, h0, u, batch,
                                        winding, params, tile_e=1024)
    jax.block_until_ready((x_out, h_out))

    x_ref, h_ref = reference_forward(src, dest, edge_attr, h0, u, batch,
                                     winding, params)

    assert x_out.shape == (E, E_OUTC) and h_out.shape == (E, DIM_H2)
    # f32-math reference with the same bf16 weights; kernel rounds activations
    # to bf16 only at MXU operands (h / outputs stay f32) -> tighter tolerance.
    x_err = float(jnp.max(jnp.abs(x_out - x_ref)))
    h_err = float(jnp.max(jnp.abs(h_out - h_ref)))
    assert jnp.allclose(x_out, x_ref, atol=3e-2, rtol=3e-2), x_err
    assert jnp.allclose(h_out, h_ref, atol=3e-2, rtol=3e-2), h_err

    print("KERNEL_OK")
</pallas_src>

<mosaic_0001>
module attributes {stable_mosaic.version = 11 : i64} {
  func.func @edge_model_kernel(%arg0: i32, %arg1: memref<32x256xbf16, #tpu.memory_space<vmem>>, %arg2: memref<4x256xbf16, #tpu.memory_space<vmem>>, %arg3: memref<32x256xf32, #tpu.memory_space<vmem>>, %arg4: memref<16x4xbf16, #tpu.memory_space<vmem>>, %arg5: memref<32x32xbf16, #tpu.memory_space<vmem>>, %arg6: memref<32x16xbf16, #tpu.memory_space<vmem>>, %arg7: memref<64x64xbf16, #tpu.memory_space<vmem>>, %arg8: memref<32x32xbf16, #tpu.memory_space<vmem>>, %arg9: memref<32x32xbf16, #tpu.memory_space<vmem>>, %arg10: memref<16x32xbf16, #tpu.memory_space<vmem>>, %arg11: memref<288x1xf32, #tpu.memory_space<vmem>>, %arg12: memref<48x256xf32, #tpu.memory_space<vmem>>) attributes {dimension_semantics = [#tpu.dimension_semantics<parallel>], iteration_bounds = array<i64: 4>, scalar_prefetch = 0 : i64, scratch_operands = 0 : i64, tpu.core_type = #tpu.core_type<tc>, window_params = [{transform_indices = @transform_0, window_bounds = array<i64: 32, 256>}, {transform_indices = @transform_1, window_bounds = array<i64: 4, 256>}, {transform_indices = @transform_2, window_bounds = array<i64: 32, 256>}, {pipeline_mode = #tpu.pipeline_mode<synchronous>, transform_indices = @transform_3, window_bounds = array<i64: 16, 4>}, {pipeline_mode = #tpu.pipeline_mode<synchronous>, transform_indices = @transform_4, window_bounds = array<i64: 32, 32>}, {pipeline_mode = #tpu.pipeline_mode<synchronous>, transform_indices = @transform_5, window_bounds = array<i64: 32, 16>}, {pipeline_mode = #tpu.pipeline_mode<synchronous>, transform_indices = @transform_6, window_bounds = array<i64: 64, 64>}, {pipeline_mode = #tpu.pipeline_mode<synchronous>, transform_indices = @transform_7, window_bounds = array<i64: 32, 32>}, {pipeline_mode = #tpu.pipeline_mode<synchronous>, transform_indices = @transform_8, window_bounds = array<i64: 32, 32>}, {pipeline_mode = #tpu.pipeline_mode<synchronous>, transform_indices = @transform_9, window_bounds = array<i64: 16, 32>}, {pipeline_mode = #tpu.pipeline_mode<synchronous>, transform_indices = @transform_10, window_bounds = array<i64: 288, 1>}, {transform_indices = @transform_11, window_bounds = array<i64: 48, 256>}]} {
    %c0 = arith.constant 0 : index
    %c0_0 = arith.constant 0 : index
    %0 = vector.load %arg2[%c0, %c0_0] : memref<4x256xbf16, #tpu.memory_space<vmem>>, vector<4x256xbf16>
    %c0_1 = arith.constant 0 : index
    %c0_2 = arith.constant 0 : index
    %1 = vector.load %arg4[%c0_1, %c0_2] : memref<16x4xbf16, #tpu.memory_space<vmem>>, vector<16x4xbf16>
    %cst = arith.constant dense<0.000000e+00> : vector<16x256xf32>
    %2 = tpu.matmul %1, %0, %cst {dimension_numbers = #tpu.dot_dimension_numbers<[1], [0], [0], [1], [0, 0, 1, 1], [], []>} : vector<16x4xbf16>, vector<4x256xbf16>, vector<16x256xf32> -> vector<16x256xf32>
    %c0_3 = arith.constant 0 : index
    %c0_4 = arith.constant 0 : index
    %3 = vector.load %arg11[%c0_3, %c0_4] : memref<288x1xf32, #tpu.memory_space<vmem>>, vector<16x1xf32>
    %4 = vector.broadcast %3 : vector<16x1xf32> to vector<16x256xf32>
    %5 = arith.addf %2, %4 : vector<16x256xf32>
    %c16 = arith.constant 16 : index
    %c0_5 = arith.constant 0 : index
    %6 = vector.load %arg11[%c16, %c0_5] : memref<288x1xf32, #tpu.memory_space<vmem>>, vector<16x1xf32>
    %c32 = arith.constant 32 : index
    %c0_6 = arith.constant 0 : index
    %7 = vector.load %arg11[%c32, %c0_6] : memref<288x1xf32, #tpu.memory_space<vmem>>, vector<16x1xf32>
    %cst_7 = arith.constant dense<0.000000e+00> : vector<256xf32>
    %8 = vector.multi_reduction <add>, %5, %cst_7 [0] : vector<16x256xf32> to vector<256xf32>
    %9 = vector.shape_cast %8 : vector<256xf32> to vector<1x256xf32>
    %cst_8 = arith.constant 1.600000e+01 : f32
    %10 = vector.broadcast %cst_8 : f32 to vector<1x256xf32>
    %11 = arith.divf %9, %10 : vector<1x256xf32>
    %12 = vector.broadcast %11 : vector<1x256xf32> to vector<16x256xf32>
    %13 = arith.subf %5, %12 : vector<16x256xf32>
    %14 = arith.mulf %13, %13 : vector<16x256xf32>
    %cst_9 = arith.constant dense<0.000000e+00> : vector<256xf32>
    %15 = vector.multi_reduction <add>, %14, %cst_9 [0] : vector<16x256xf32> to vector<256xf32>
    %16 = vector.shape_cast %15 : vector<256xf32> to vector<1x256xf32>
    %cst_10 = arith.constant 1.600000e+01 : f32
    %17 = vector.broadcast %cst_10 : f32 to vector<1x256xf32>
    %18 = arith.divf %16, %17 : vector<1x256xf32>
    %19 = vector.broadcast %11 : vector<1x256xf32> to vector<16x256xf32>
    %20 = arith.subf %5, %19 : vector<16x256xf32>
    %cst_11 = arith.constant 9.99999974E-6 : f32
    %21 = vector.broadcast %cst_11 : f32 to vector<1x256xf32>
    %22 = arith.addf %18, %21 : vector<1x256xf32>
    %23 = math.rsqrt %22 : vector<1x256xf32>
    %24 = vector.broadcast %23 : vector<1x256xf32> to vector<16x256xf32>
    %25 = arith.mulf %20, %24 : vector<16x256xf32>
    %26 = vector.broadcast %6 : vector<16x1xf32> to vector<16x256xf32>
    %27 = arith.mulf %25, %26 : vector<16x256xf32>
    %28 = vector.broadcast %7 : vector<16x1xf32> to vector<16x256xf32>
    %29 = arith.addf %27, %28 : vector<16x256xf32>
    %cst_12 = arith.constant 0.000000e+00 : f32
    %30 = vector.broadcast %cst_12 : f32 to vector<16x256xf32>
    %31 = arith.maximumf %29, %30 : vector<16x256xf32>
    %c0_13 = arith.constant 0 : index
    %c0_14 = arith.constant 0 : index
    %32 = vector.load %arg1[%c0_13, %c0_14] : memref<32x256xbf16, #tpu.memory_space<vmem>>, vector<32x256xbf16>
    %c0_15 = arith.constant 0 : index
    %c0_16 = arith.constant 0 : index
    %33 = vector.load %arg5[%c0_15, %c0_16] : memref<32x32xbf16, #tpu.memory_space<vmem>>, vector<32x32xbf16>
    %cst_17 = arith.constant dense<0.000000e+00> : vector<32x256xf32>
    %34 = tpu.matmul %33, %32, %cst_17 {dimension_numbers = #tpu.dot_dimension_numbers<[1], [0], [0], [1], [0, 0, 1, 1], [], []>} : vector<32x32xbf16>, vector<32x256xbf16>, vector<32x256xf32> -> vector<32x256xf32>
    %35 = arith.truncf %31 : vector<16x256xf32> to vector<16x256xbf16>
    %c0_18 = arith.constant 0 : index
    %c0_19 = arith.constant 0 : index
    %36 = vector.load %arg6[%c0_18, %c0_19] : memref<32x16xbf16, #tpu.memory_space<vmem>>, vector<32x16xbf16>
    %cst_20 = arith.constant dense<0.000000e+00> : vector<32x256xf32>
    %37 = tpu.matmul %36, %35, %cst_20 {dimension_numbers = #tpu.dot_dimension_numbers<[1], [0], [0], [1], [0, 0, 1, 1], [], []>} : vector<32x16xbf16>, vector<16x256xbf16>, vector<32x256xf32> -> vector<32x256xf32>
    %38 = arith.addf %34, %37 : vector<32x256xf32>
    %c48 = arith.constant 48 : index
    %c0_21 = arith.constant 0 : index
    %39 = vector.load %arg11[%c48, %c0_21] : memref<288x1xf32, #tpu.memory_space<vmem>>, vector<32x1xf32>
    %40 = vector.broadcast %39 : vector<32x1xf32> to vector<32x256xf32>
    %41 = arith.addf %38, %40 : vector<32x256xf32>
    %c80 = arith.constant 80 : index
    %c0_22 = arith.constant 0 : index
    %42 = vector.load %arg11[%c80, %c0_22] : memref<288x1xf32, #tpu.memory_space<vmem>>, vector<32x1xf32>
    %c112 = arith.constant 112 : index
    %c0_23 = arith.constant 0 : index
    %43 = vector.load %arg11[%c112, %c0_23] : memref<288x1xf32, #tpu.memory_space<vmem>>, vector<32x1xf32>
    %cst_24 = arith.constant dense<0.000000e+00> : vector<256xf32>
    %44 = vector.multi_reduction <add>, %41, %cst_24 [0] : vector<32x256xf32> to vector<256xf32>
    %45 = vector.shape_cast %44 : vector<256xf32> to vector<1x256xf32>
    %cst_25 = arith.constant 3.200000e+01 : f32
    %46 = vector.broadcast %cst_25 : f32 to vector<1x256xf32>
    %47 = arith.divf %45, %46 : vector<1x256xf32>
    %48 = vector.broadcast %47 : vector<1x256xf32> to vector<32x256xf32>
    %49 = arith.subf %41, %48 : vector<32x256xf32>
    %50 = arith.mulf %49, %49 : vector<32x256xf32>
    %cst_26 = arith.constant dense<0.000000e+00> : vector<256xf32>
    %51 = vector.multi_reduction <add>, %50, %cst_26 [0] : vector<32x256xf32> to vector<256xf32>
    %52 = vector.shape_cast %51 : vector<256xf32> to vector<1x256xf32>
    %cst_27 = arith.constant 3.200000e+01 : f32
    %53 = vector.broadcast %cst_27 : f32 to vector<1x256xf32>
    %54 = arith.divf %52, %53 : vector<1x256xf32>
    %55 = vector.broadcast %47 : vector<1x256xf32> to vector<32x256xf32>
    %56 = arith.subf %41, %55 : vector<32x256xf32>
    %cst_28 = arith.constant 9.99999974E-6 : f32
    %57 = vector.broadcast %cst_28 : f32 to vector<1x256xf32>
    %58 = arith.addf %54, %57 : vector<1x256xf32>
    %59 = math.rsqrt %58 : vector<1x256xf32>
    %60 = vector.broadcast %59 : vector<1x256xf32> to vector<32x256xf32>
    %61 = arith.mulf %56, %60 : vector<32x256xf32>
    %62 = vector.broadcast %42 : vector<32x1xf32> to vector<32x256xf32>
    %63 = arith.mulf %61, %62 : vector<32x256xf32>
    %64 = vector.broadcast %43 : vector<32x1xf32> to vector<32x256xf32>
    %65 = arith.addf %63, %64 : vector<32x256xf32>
    %cst_29 = arith.constant 0.000000e+00 : f32
    %66 = vector.broadcast %cst_29 : f32 to vector<32x256xf32>
    %67 = arith.maximumf %65, %66 : vector<32x256xf32>
    %c0_30 = arith.constant 0 : index
    %c0_31 = arith.constant 0 : index
    %68 = vector.load %arg3[%c0_30, %c0_31] : memref<32x256xf32, #tpu.memory_space<vmem>>, vector<32x256xf32>
    %69 = arith.truncf %67 : vector<32x256xf32> to vector<32x256xbf16>
    %70 = arith.truncf %68 : vector<32x256xf32> to vector<32x256xbf16>
    %71 = tpu.concatenate %69, %70 in 0 : vector<32x256xbf16>, vector<32x256xbf16> -> vector<64x256xbf16>
    %c0_32 = arith.constant 0 : index
    %c0_33 = arith.constant 0 : index
    %72 = vector.load %arg7[%c0_32, %c0_33] : memref<64x64xbf16, #tpu.memory_space<vmem>>, vector<64x64xbf16>
    %cst_34 = arith.constant dense<0.000000e+00> : vector<64x256xf32>
    %73 = tpu.matmul %72, %71, %cst_34 {dimension_numbers = #tpu.dot_dimension_numbers<[1], [0], [0], [1], [0, 0, 1, 1], [], []>} : vector<64x64xbf16>, vector<64x256xbf16>, vector<64x256xf32> -> vector<64x256xf32>
    %c144 = arith.constant 144 : index
    %c0_35 = arith.constant 0 : index
    %74 = vector.load %arg11[%c144, %c0_35] : memref<288x1xf32, #tpu.memory_space<vmem>>, vector<64x1xf32>
    %75 = vector.broadcast %74 : vector<64x1xf32> to vector<64x256xf32>
    %76 = arith.addf %73, %75 : vector<64x256xf32>
    %77 = vector.extract_strided_slice %76 {offsets = [0, 0], sizes = [32, 256], strides = [1, 1]} : vector<64x256xf32> to vector<32x256xf32>
    %78 = arith.negf %77 : vector<32x256xf32>
    %79 = math.exp %78 : vector<32x256xf32>
    %cst_36 = arith.constant 1.000000e+00 : f32
    %80 = vector.broadcast %cst_36 : f32 to vector<32x256xf32>
    %81 = arith.addf %80, %79 : vector<32x256xf32>
    %82 = arith.divf %80, %81 : vector<32x256xf32>
    %83 = vector.extract_strided_slice %76 {offsets = [32, 0], sizes = [32, 256], strides = [1, 1]} : vector<64x256xf32> to vector<32x256xf32>
    %84 = arith.negf %83 : vector<32x256xf32>
    %85 = math.exp %84 : vector<32x256xf32>
    %cst_37 = arith.constant 1.000000e+00 : f32
    %86 = vector.broadcast %cst_37 : f32 to vector<32x256xf32>
    %87 = arith.addf %86, %85 : vector<32x256xf32>
    %88 = arith.divf %86, %87 : vector<32x256xf32>
    %c0_38 = arith.constant 0 : index
    %c0_39 = arith.constant 0 : index
    %89 = vector.load %arg8[%c0_38, %c0_39] : memref<32x32xbf16, #tpu.memory_space<vmem>>, vector<32x32xbf16>
    %cst_40 = arith.constant dense<0.000000e+00> : vector<32x256xf32>
    %90 = tpu.matmul %89, %69, %cst_40 {dimension_numbers = #tpu.dot_dimension_numbers<[1], [0], [0], [1], [0, 0, 1, 1], [], []>} : vector<32x32xbf16>, vector<32x256xbf16>, vector<32x256xf32> -> vector<32x256xf32>
    %c208 = arith.constant 208 : index
    %c0_41 = arith.constant 0 : index
    %91 = vector.load %arg11[%c208, %c0_41] : memref<288x1xf32, #tpu.memory_space<vmem>>, vector<32x1xf32>
    %92 = vector.broadcast %91 : vector<32x1xf32> to vector<32x256xf32>
    %93 = arith.addf %90, %92 : vector<32x256xf32>
    %c0_42 = arith.constant 0 : index
    %c0_43 = arith.constant 0 : index
    %94 = vector.load %arg9[%c0_42, %c0_43] : memref<32x32xbf16, #tpu.memory_space<vmem>>, vector<32x32xbf16>
    %cst_44 = arith.constant dense<0.000000e+00> : vector<32x256xf32>
    %95 = tpu.matmul %94, %70, %cst_44 {dimension_numbers = #tpu.dot_dimension_numbers<[1], [0], [0], [1], [0, 0, 1, 1], [], []>} : vector<32x32xbf16>, vector<32x256xbf16>, vector<32x256xf32> -> vector<32x256xf32>
    %c240 = arith.constant 240 : index
    %c0_45 = arith.constant 0 : index
    %96 = vector.load %arg11[%c240, %c0_45] : memref<288x1xf32, #tpu.memory_space<vmem>>, vector<32x1xf32>
    %97 = vector.broadcast %96 : vector<32x1xf32> to vector<32x256xf32>
    %98 = arith.addf %95, %97 : vector<32x256xf32>
    %99 = arith.mulf %82, %98 : vector<32x256xf32>
    %100 = arith.addf %93, %99 : vector<32x256xf32>
    %101 = math.tanh %100 : vector<32x256xf32>
    %cst_46 = arith.constant 1.000000e+00 : f32
    %102 = vector.broadcast %cst_46 : f32 to vector<32x256xf32>
    %103 = arith.subf %102, %88 : vector<32x256xf32>
    %104 = arith.mulf %103, %101 : vector<32x256xf32>
    %105 = arith.mulf %88, %68 : vector<32x256xf32>
    %106 = arith.addf %104, %105 : vector<32x256xf32>
    %107 = arith.truncf %106 : vector<32x256xf32> to vector<32x256xbf16>
    %c0_47 = arith.constant 0 : index
    %c0_48 = arith.constant 0 : index
    %108 = vector.load %arg10[%c0_47, %c0_48] : memref<16x32xbf16, #tpu.memory_space<vmem>>, vector<16x32xbf16>
    %cst_49 = arith.constant dense<0.000000e+00> : vector<16x256xf32>
    %109 = tpu.matmul %108, %107, %cst_49 {dimension_numbers = #tpu.dot_dimension_numbers<[1], [0], [0], [1], [0, 0, 1, 1], [], []>} : vector<16x32xbf16>, vector<32x256xbf16>, vector<16x256xf32> -> vector<16x256xf32>
    %c272 = arith.constant 272 : index
    %c0_50 = arith.constant 0 : index
    %110 = vector.load %arg11[%c272, %c0_50] : memref<288x1xf32, #tpu.memory_space<vmem>>, vector<16x1xf32>
    %111 = vector.broadcast %110 : vector<16x1xf32> to vector<16x256xf32>
    %112 = arith.addf %109, %111 : vector<16x256xf32>
    %c0_51 = arith.constant 0 : index
    %c0_52 = arith.constant 0 : index
    %113 = vector.load %arg12[%c0_51, %c0_52] : memref<48x256xf32, #tpu.memory_space<vmem>>, vector<16x256xf32>
    tpu.vector_store %arg12[%c0_51, %c0_52], %112 {strides = array<i32>} : memref<48x256xf32, #tpu.memory_space<vmem>>, vector<16x256xf32>,
    %c16_53 = arith.constant 16 : index
    %c0_54 = arith.constant 0 : index
    %114 = vector.load %arg12[%c16_53, %c0_54] : memref<48x256xf32, #tpu.memory_space<vmem>>, vector<32x256xf32>
    tpu.vector_store %arg12[%c16_53, %c0_54], %106 {strides = array<i32>} : memref<48x256xf32, #tpu.memory_space<vmem>>, vector<32x256xf32>,
    return
  }
  func.func @transform_0(%arg0: i32) -> (i32, i32) {
    %c0_i32 = arith.constant 0 : i32
    %c0_i32_0 = arith.constant 0 : i32
    return %c0_i32, %arg0 : i32, i32
  }
  func.func @transform_1(%arg0: i32) -> (i32, i32) {
    %c0_i32 = arith.constant 0 : i32
    %c0_i32_0 = arith.constant 0 : i32
    return %c0_i32, %arg0 : i32, i32
  }
  func.func @transform_2(%arg0: i32) -> (i32, i32) {
    %c0_i32 = arith.constant 0 : i32
    %c0_i32_0 = arith.constant 0 : i32
    return %c0_i32, %arg0 : i32, i32
  }
  func.func @transform_3(%arg0: i32) -> (i32, i32) {
    %c0_i32 = arith.constant 0 : i32
    %c0_i32_0 = arith.constant 0 : i32
    %c0_i32_1 = arith.constant 0 : i32
    return %c0_i32, %c0_i32_0 : i32, i32
  }
  func.func @transform_4(%arg0: i32) -> (i32, i32) {
    %c0_i32 = arith.constant 0 : i32
    %c0_i32_0 = arith.constant 0 : i32
    %c0_i32_1 = arith.constant 0 : i32
    return %c0_i32, %c0_i32_0 : i32, i32
  }
  func.func @transform_5(%arg0: i32) -> (i32, i32) {
    %c0_i32 = arith.constant 0 : i32
    %c0_i32_0 = arith.constant 0 : i32
    %c0_i32_1 = arith.constant 0 : i32
    return %c0_i32, %c0_i32_0 : i32, i32
  }
  func.func @transform_6(%arg0: i32) -> (i32, i32) {
    %c0_i32 = arith.constant 0 : i32
    %c0_i32_0 = arith.constant 0 : i32
    %c0_i32_1 = arith.constant 0 : i32
    return %c0_i32, %c0_i32_0 : i32, i32
  }
  func.func @transform_7(%arg0: i32) -> (i32, i32) {
    %c0_i32 = arith.constant 0 : i32
    %c0_i32_0 = arith.constant 0 : i32
    %c0_i32_1 = arith.constant 0 : i32
    return %c0_i32, %c0_i32_0 : i32, i32
  }
  func.func @transform_8(%arg0: i32) -> (i32, i32) {
    %c0_i32 = arith.constant 0 : i32
    %c0_i32_0 = arith.constant 0 : i32
    %c0_i32_1 = arith.constant 0 : i32
    return %c0_i32, %c0_i32_0 : i32, i32
  }
  func.func @transform_9(%arg0: i32) -> (i32, i32) {
    %c0_i32 = arith.constant 0 : i32
    %c0_i32_0 = arith.constant 0 : i32
    %c0_i32_1 = arith.constant 0 : i32
    return %c0_i32, %c0_i32_0 : i32, i32
  }
  func.func @transform_10(%arg0: i32) -> (i32, i32) {
    %c0_i32 = arith.constant 0 : i32
    %c0_i32_0 = arith.constant 0 : i32
    %c0_i32_1 = arith.constant 0 : i32
    return %c0_i32, %c0_i32_0 : i32, i32
  }
  func.func @transform_11(%arg0: i32) -> (i32, i32) {
    %c0_i32 = arith.constant 0 : i32
    %c0_i32_0 = arith.constant 0 : i32
    return %c0_i32, %arg0 : i32, i32
  }
}

</mosaic_0001>

<bundles_post_ra>
// kernel: recurrent_edge_model.1
= control target key start
LH: loop header
LB: loop body
LE: loop exit
PB: predicated region body
PF: predicated region fallthrough
CT: control target
= control target key end

     0   :  { %s2064_s17 = smov 0   ;;  %s2066_s18 = smov 0   ;;  %s2411_s0 = inlined_call_operand.vmem [shape: bf16[32,1024], index: 0, kind: input, shape index: {}]   ;;  %s2412_s1 = inlined_call_operand.vmem [shape: bf16[4,1024], index: 1, kind: input, shape index: {}]   ;;  %s2413_s2 = inlined_call_operand.vmem [shape: f32[32,1024], index: 2, kind: input, shape index: {}]   ;;  %s2414_s3 = inlined_call_operand.vmem [shape: bf16[16,4], index: 3, kind: input, shape index: {}]   ;;  %s2415_s4 = inlined_call_operand.vmem [shape: bf16[32,32], index: 4, kind: input, shape index: {}]   ;;  %s2416_s5 = inlined_call_operand.vmem [shape: bf16[32,16], index: 5, kind: input, shape index: {}]   ;;  %s2417_s6 = inlined_call_operand.vmem [shape: bf16[64,64], index: 6, kind: input, shape index: {}]   ;;  %s2418_s7 = inlined_call_operand.vmem [shape: bf16[32,32], index: 7, kind: input, shape index: {}]   ;;  %s2419_s8 = inlined_call_operand.vmem [shape: bf16[32,32], index: 8, kind: input, shape index: {}]   ;;  %s2420_s9 = inlined_call_operand.vmem [shape: bf16[16,32], index: 9, kind: input, shape index: {}]   ;;  %s2421_s10 = inlined_call_operand.vmem [shape: f32[288,1], index: 10, kind: input, shape index: {}]   ;;  %s2422_s11 = inlined_call_operand.vmem [shape: f32[48,1024], index: 11, kind: output, shape index: {}]  }
   0x1   :  { %s2068_s19 = smov 0  }
   0x2 LB: > { %s2080_s20 = sadd.s32 4294967295, %s2001_s19   ;;  %s2083_s21 = sadd.s32 1, %s2001_s19   ;;  %s2001_s19 = sphi %s2068_s19, %s2427_s19   ;;  %s1997_s18 = sphi %s2066_s18, %s2426_s18   ;;  %s1993_s17 = sphi %s2064_s17, %s2425_s17  }
   0x3   : > { %s25_s22 = ssub.s32 %s2001_s19, %s2083_s21  ;;  %s28_s23 = sadd.s32 1, %s1997_s18 }
   0x4   : > { %p26_p0 = scmp.eq.s32.totalorder %s25_s22, 0  ;;  %p35_p1 = scmp.ne.s32.totalorder %s1997_s18, %s1993_s17 }
   0x5   : > { %p36_p2 = scmp.eq.s32.totalorder %s2001_s19, 0  ;;  %p285_p3 = scmp.eq.s32.totalorder %s2080_s20, 3 }
   0x6   : > { %s2093_s24 = scalar_select %p26_p0, %s1997_s18, %s28_s23  }
   0x7   : > { %p2095_p4 = por %p36_p2, %p35_p1  ;;  %p2099_p5 = por %p285_p3, %p35_p1 }
   0x8   : > { %p1766_p6 = scmp.ge.s32.totalorder %s2001_s19, 4 }
   0xa   : > { %331 = sbr.rel (%p1766_p6) target bundleno = 33 (0x21), region = 48 }
  0x11   : > { %334 = sbr.rel (!%p2095_p4) target bundleno = 25 (0x19), region = 52  ;;  %s336_s27 = sand.u32 (%p2095_p4), 1, %s1997_s18  }
  0x12   : > { %s1832_s28 = sshll.u32 (%p2095_p4), %s2001_s19, 3  ;;  %s1767_s29 = sshll.u32 (%p2095_p4), %s336_s27, 5 }
  0x13   : > { %s341_s13 = scalar_lea.vmem (%p2095_p4), %s2411_s0, %s1832_s28  ;;  %s338_s14 = scalar_lea.vmem (%p2095_p4), [#allocation2], %s1767_s29 }
  0x14   : > { %v375_v0 = vld [vmem:[%s341_s13] sm:$0xff] (%p2095_p4) }
  0x15   : > { %v377_v1 = vld [vmem:[%s341_s13 + $0x20] sm:$0xff] (%p2095_p4)  ;;  %376 = vst [vmem:[%s338_s14] sm:$0xff] (%p2095_p4), %v375_v0 }
  0x16   : > { %v379_v2 = vld [vmem:[%s341_s13 + $0x40] sm:$0xff] (%p2095_p4)  ;;  %378 = vst [vmem:[%s338_s14 + $0x8] sm:$0xff] (%p2095_p4), %v377_v1 }
  0x17   : > { %380 = vst [vmem:[%s338_s14 + $0x10] sm:$0xff] (%p2095_p4), %v379_v2  ;;  %v381_v3 = vld [vmem:[%s341_s13 + $0x60] sm:$0xff] (%p2095_p4) }
  0x18   : > { %382 = vst [vmem:[%s338_s14 + $0x18] sm:$0xff] %v381_v3 }
  0x19 PF: > { %397 = sbr.rel (!%p2095_p4) target bundleno = 33 (0x21), region = 94  ;;  %s399_s15 = sand.u32 (%p2095_p4), 1, %s1997_s18  }
  0x1a   : > { %s1833_s16 = sshll.u32 (%p2095_p4), %s2001_s19, 4  ;;  %s1770_s22 = sshll.u32 (%p2095_p4), %s399_s15, 6 }
  0x1b   : > { %s404_s28 = scalar_lea.vmem (%p2095_p4), %s2413_s2, %s1833_s16  ;;  %s401_s29 = scalar_lea.vmem (%p2095_p4), [#allocation3], %s1770_s22 }
  0x1c   : > { %v417_v4 = vld [vmem:[%s404_s28] sm:$0xff] (%p2095_p4)  ;;  %v419_v5 = vld [vmem:[%s404_s28 + $0x8] sm:$0xff] (%p2095_p4) }
  0x1d   : > { %v421_v6 = vld [vmem:[%s404_s28 + $0x40] sm:$0xff] (%p2095_p4)  ;;  %418 = vst [vmem:[%s401_s29] sm:$0xff] (%p2095_p4), %v417_v4  ;;  %420 = vst [vmem:[%s401_s29 + $0x8] sm:$0xff] (%p2095_p4), %v419_v5  ;;  %v423_v7 = vld [vmem:[%s404_s28 + $0x48] sm:$0xff] (%p2095_p4) }
  0x1e   : > { %422 = vst [vmem:[%s401_s29 + $0x10] sm:$0xff] (%p2095_p4), %v421_v6  ;;  %v425_v8 = vld [vmem:[%s404_s28 + $0x80] sm:$0xff] (%p2095_p4)  ;;  %v427_v9 = vld [vmem:[%s404_s28 + $0x88] sm:$0xff] (%p2095_p4)  ;;  %424 = vst [vmem:[%s401_s29 + $0x18] sm:$0xff] (%p2095_p4), %v423_v7 }
  0x1f   : > { %426 = vst [vmem:[%s401_s29 + $0x20] sm:$0xff] (%p2095_p4), %v425_v8  ;;  %428 = vst [vmem:[%s401_s29 + $0x28] sm:$0xff] (%p2095_p4), %v427_v9  ;;  %v429_v10 = vld [vmem:[%s404_s28 + $0xc0] sm:$0xff] (%p2095_p4)  ;;  %v431_v11 = vld [vmem:[%s404_s28 + $0xc8] sm:$0xff] (%p2095_p4) }
  0x20   : > { %430 = vst [vmem:[%s401_s29 + $0x30] sm:$0xff] %v429_v10  ;;  %432 = vst [vmem:[%s401_s29 + $0x38] sm:$0xff] %v431_v11 }
  0x21 PF: > { %p1773_p7 = scmp.ge.s32.totalorder %s2001_s19, 1  ;;  %p437_p8 = scmp.lt.s32.totalorder %s2001_s19, 5 }
  0x23   : > { %p438_p9 = pnand %p1773_p7, %p437_p8 }
  0x24   : > { %s1776_s25 = sshll.u32 (!%p438_p9), %s2080_s20, 1  ;;  %v2003_v12 = vmov (!%p438_p9), 0   ;;  %v511_v13 = vld [vmem:[%s2421_s10] sm:$0xff] (!%p438_p9)  ;;  %v512_v14 = vld [vmem:[%s2421_s10 + $0x8] sm:$0xff] (!%p438_p9)  ;;  %vm541_vm0 = vcmask (!%p438_p9), 1041408   ;;  %v591_v15 = vld [vmem:[%s2421_s10 + $0x10] sm:$0xff] (!%p438_p9) }
  0x25   : > { %441 = sbr.rel (%p438_p9) target bundleno = 1162 (0x48a), region = 117  ;;  %p500_p10 = scmp.lt.s32.totalorder (!%p438_p9), %s1776_s25, 7  ;;  %580 = vmatprep.mubr.bf16.mxu0 (!%p438_p9), %v2003_v12  ;;  %1869 = vset.pattern.permute.xlu0 (!%p438_p9), %v2003_v12  ;;  %v593_v17 = vld [vmem:[%s2421_s10 + $0x20] sm:$0xff] (!%p438_p9)  ;;  %v592_v20 = vld [vmem:[%s2421_s10 + $0x18] sm:$0xff] (!%p438_p9)  ;;  %vm537_vm1 = vcmask (!%p438_p9), 31744   ;;  %v850_v22 = vld [vmem:[%s2421_s10 + $0x30] sm:$0xff] (!%p438_p9) }
  0x26   : > { %515 = vperm.xlu0 (!%p438_p9), %1869, %v511_v13   ;;  %1870 = vset.pattern.permute.xlu1 (!%p438_p9), %v2003_v12  ;;  %v1871_v21 = vld [vmem:[%s2414_s3] sm:$0xff] (!%p438_p9)   ;;  %v594_v23 = vld [vmem:[%s2421_s10 + $0x28] sm:$0xff] (!%p438_p9)  ;;  %v851_v25 = vld [vmem:[%s2421_s10 + $0x38] sm:$0xff] (!%p438_p9)  ;;  %vm700_vm2 = vcmask (!%p438_p9), 130048   ;;  %vm790_vm3 = vcmask (!%p438_p9), 261120   ;;  %vm1115_vm4 = vcmask (!%p438_p9), 523264  }
  0x27   : > { %739 = vmatprep.mubr.bf16.mxu1 (!%p438_p9), %v2003_v12  ;;  %646 = vperm.xlu1 (!%p438_p9), %1870, %v591_v15   ;;  %v852_v24 = vld [vmem:[%s2421_s10 + $0x40] sm:$0xff] (!%p438_p9)  ;;  %v882_v26 = vld [vmem:[%s2421_s10 + $0x50] sm:$0xff] (!%p438_p9)  ;;  %v853_v27 = vld [vmem:[%s2421_s10 + $0x48] sm:$0xff] (!%p438_p9) }
  0x28   : > { %v886_v28 = vld [vmem:[%s2421_s10 + $0x70] sm:$0xff] (!%p438_p9)  ;;  %v883_v29 = vld [vmem:[%s2421_s10 + $0x58] sm:$0xff] (!%p438_p9)  ;;  %v884_v30 = vld [vmem:[%s2421_s10 + $0x60] sm:$0xff] (!%p438_p9) }
  0x29   : > { %v887_v31 = vld [vmem:[%s2421_s10 + $0x78] sm:$0xff] (!%p438_p9)  ;;  %v888_v32 = vld [vmem:[%s2421_s10 + $0x80] sm:$0xff] (!%p438_p9)  ;;  %v885_v33 = vld [vmem:[%s2421_s10 + $0x68] sm:$0xff] (!%p438_p9) }
  0x2a   : > { %520 = vperm.xlu0 (!%p438_p9), %1869, %v512_v14   ;;  %v1047_v34 = vld [vmem:[%s2421_s10 + $0x90] sm:$0xff] (!%p438_p9)  ;;  %v889_v35 = vld [vmem:[%s2421_s10 + $0x88] sm:$0xff] (!%p438_p9)  ;;  %v1049_v36 = vld [vmem:[%s2421_s10 + $0xa0] sm:$0xff] (!%p438_p9) }
  0x2b   : > { %651 = vperm.xlu1 (!%p438_p9), %1870, %v592_v20   ;;  %v1048_v37 = vld [vmem:[%s2421_s10 + $0x98] sm:$0xff] (!%p438_p9)  ;;  %v1051_v38 = vld [vmem:[%s2421_s10 + $0xb0] sm:$0xff] (!%p438_p9)  ;;  %v1050_v39 = vld [vmem:[%s2421_s10 + $0xa8] sm:$0xff] (!%p438_p9) }
  0x2c   : > { %s2429_s25 = smov (!%p500_p10, %s1776_s25), 7  ;;  %v1053_v40 = vld [vmem:[%s2421_s10 + $0xc0] sm:$0xff]  ;;  %v1052_v41 = vld [vmem:[%s2421_s10 + $0xb8] sm:$0xff]  ;;  %v1398_v42 = vld [vmem:[%s2421_s10 + $0xf0] sm:$0xff]  ;;  %s1834_s15 = sshll.u32 (%p2099_p5), %s2080_s20, 4 }
  0x2d   : > { %s1777_s14 = sshll.u32 %s2429_s25, 1  ;;  %v1054_v43 = vld [vmem:[%s2421_s10 + $0xc8] sm:$0xff]  ;;  %v1301_v44 = vld [vmem:[%s2421_s10 + $0xd0] sm:$0xff]  ;;  %v1399_v45 = vld [vmem:[%s2421_s10 + $0xf8] sm:$0xff]  ;;  %s2241_s25 = sand.u32 1, %s1993_s17  }
  0x2e   : > { %s503_s27 = scalar_lea.vmem %s2412_s1, %s1777_s14  ;;  %660 = vperm.xlu0 %1869, %v593_v17   ;;  %v1400_v46 = vld [vmem:[%s2421_s10 + $0x100] sm:$0xff]  ;;  %v1302_v47 = vld [vmem:[%s2421_s10 + $0xd8] sm:$0xff]  ;;  %v1401_v49 = vld [vmem:[%s2421_s10 + $0x108] sm:$0xff]  ;;  %s1774_s12 = sshll.u32 %s2241_s25, 5 }
  0x2f   : > { %v1779_v16 = vld.sshfl [vmem:[%s503_s27] sm:$0x33 pattern:$0x76325410]  ;;  %665 = vperm.xlu1 %1870, %v594_v23   ;;  %v1553_v50 = vld [vmem:[%s2421_s10 + $0x110] sm:$0xff]  ;;  %v1304_v51 = vld [vmem:[%s2421_s10 + $0xe8] sm:$0xff]  ;;  %s1637_s23 = scalar_lea.vmem (%p2099_p5), %s2422_s11, %s1834_s15 }
  0x30   : > { %v536_v18 = vcombine.high %v1779_v16, %v1779_v16  ;;  %v543_v19 = vsel %vm541_vm0, %v1779_v16, 0  ;;  %v1303_v48 = vld [vmem:[%s2421_s10 + $0xe0] sm:$0xff]  ;;  %v1554_v52 = vld [vmem:[%s2421_s10 + $0x118] sm:$0xff]  ;;  %s2244_s13 = scalar_lea.vmem [#allocation2], %s1774_s12  ;;  %s1775_s28 = sshll.u32 %s2241_s25, 6 }
  0x31   : > { %s453_s29 = scalar_lea.vmem [#allocation3], %s1775_s28  ;;  %s1843_s17 = smul.u32 96, %s2241_s25 }
  0x32   : > { %1780 = vmatprep.subr.msk.bf16.mxu0 %vm541_vm0, %v536_v18  ;;  %856 = vperm.xlu0 %1869, %v850_v22  }
  0x33   : > { %549 = vmatpush1.bf16.msra.mxu0 %v543_v19  ;;  %861 = vperm.xlu1 %1870, %v851_v25   ;;  %s2361_s25 = scalar_lea.vmem [#allocation4], %s1843_s17 }
  0x36   : > { %1781 = vmatmul.mubr.msk.bf16.vlgmr.msra.gmra.mrb[0].mxu0 %vm537_vm1, %v1871_v21  ;;  %866 = vperm.xlu0 %1869, %v852_v24  }
  0x37   : > { %1160 = vmatprep.mubr.bf16.mxu0 %v2003_v12  ;;  %871 = vperm.xlu1 %1870, %v853_v27  }
  0x3a   : > { %961 = vperm.xlu0 %1869, %v882_v26  }
  0x3b   : > { %966 = vperm.xlu1 %1870, %v883_v29  }
  0x3e   : > { %989 = vperm.xlu0 %1869, %v886_v28  }
  0x3f   : > { %994 = vperm.xlu1 %1870, %v887_v31  }
  0x42   : > { %971 = vperm.xlu0 %1869, %v884_v30  }
  0x43   : > { %976 = vperm.xlu1 %1870, %v885_v33  }
  0x46   : > { %999 = vperm.xlu0 %1869, %v888_v32  }
  0x47   : > { %1004 = vperm.xlu1 %1870, %v889_v35  }
  0x4a   : > { %1057 = vperm.xlu0 %1869, %v1047_v34  }
  0x4b   : > { %1062 = vperm.xlu1 %1870, %v1048_v37  }
  0x4e   : > { %1067 = vperm.xlu0 %1869, %v1049_v36  }
  0x4f   : > { %1072 = vperm.xlu1 %1870, %v1050_v39  }
  0x52   : > { %1077 = vperm.xlu0 %1869, %v1051_v38  }
  0x53   : > { %1082 = vperm.xlu1 %1870, %v1052_v41  }
  0x56   : > { %1087 = vperm.xlu0 %1869, %v1053_v40  }
  0x57   : > { %1092 = vperm.xlu1 %1870, %v1054_v43  }
  0x5a   : > { %1404 = vperm.xlu0 %1869, %v1398_v42  }
  0x5b   : > { %1409 = vperm.xlu1 %1870, %v1399_v45  }
  0x5e   : > { %1307 = vperm.xlu0 %1869, %v1301_v44  }
  0x5f   : > { %1312 = vperm.xlu1 %1870, %v1302_v47  }
  0x62   : > { %1414 = vperm.xlu0 %1869, %v1400_v46  }
  0x63   : > { %1419 = vperm.xlu1 %1870, %v1401_v49  }
  0x66   : > { %1317 = vperm.xlu0 %1869, %v1303_v48  }
  0x67   : > { %1322 = vperm.xlu1 %1870, %v1304_v51  }
  0x6a   : > { %1557 = vperm.xlu0 %1869, %v1553_v50  }
  0x6b   : > { %1562 = vperm.xlu1 %1870, %v1554_v52  }
  0xa5   : > { %v516_v53 = vpop.permute.xlu0 %515 }
  0xa6   : > { %v647_v42 = vpop.permute.xlu1 %646 }
  0xa9   : > { %v521_v56 = vpop.permute.xlu0 %520 }
  0xaa   : > { %v652_v43 = vpop.permute.xlu1 %651 }
  0xad   : > { %v661_v52 = vpop.permute.xlu0 %660 }
 0x109   : > { %v582_v54 = vpop.f32.mrb[0].mxu0 }
 0x10a   : > { %v584_v55 = vpop.f32.mrb[1].mxu0  ;;  %v583_v58 = vadd.f32 %v582_v54, %v516_v53 }
 0x10b   : > { %v586_v57 = vpop.f32.mrb[2].mxu0  ;;  %v585_v61 = vadd.f32 %v584_v55, %v516_v53  ;;  %v666_v53 = vpop.permute.xlu1 %665 }
 0x10c   : > { %v587_v59 = vadd.f32 %v586_v57, %v521_v56  ;;  %v588_v60 = vpop.f32.mrb[3].mxu0 }
 0x10d   : > { %v589_v62 = vadd.f32 %v588_v60, %v521_v56 }
 0x10e   : > { %v595_v63 = vadd.f32 %v587_v59, %v583_v58 }
 0x10f   : > { %v602_v0 = vadd.f32 %v589_v62, %v585_v61 }
 0x110   : > { %v596_v1 = vrot.slane %v595_v63, 4 }
 0x111   : > { %v603_v2 = vrot.slane %v602_v0, 4 }
 0x112   : > { %v597_v3 = vadd.f32 %v596_v1, %v595_v63 }
 0x113   : > { %v604_v4 = vadd.f32 %v603_v2, %v602_v0  ;;  %v1875_v2 = vld [vmem:[%s2244_s13 + $0x4] ss:$8 sps:$4 sm:$0xff]  }
 0x114   : > { %v598_v5 = vrot.slane %v597_v3, 2 }
 0x115   : > { %v605_v6 = vrot.slane %v604_v4, 2 }
 0x116   : > { %v599_v7 = vadd.f32 %v598_v5, %v597_v3  ;;  %v1872_v3 = vld [vmem:[%s2416_s5] sm:$0xff]   ;;  %v1879_v5 = vld [vmem:[%s2244_s13 + $0x14] ss:$8 sps:$4 sm:$0xff]  }
 0x117   : > { %v606_v8 = vadd.f32 %v605_v6, %v604_v4  ;;  %v1873_v4 = vld [vmem:[%s2244_s13] ss:$8 sps:$4 sm:$0xff]   ;;  %v1877_v6 = vld [vmem:[%s2244_s13 + $0x10] ss:$8 sps:$4 sm:$0xff]  }
 0x118   : > { %v600_v9 = vrot.slane %v599_v7, 1 }
 0x119   : > { %v607_v10 = vrot.slane %v606_v8, 1 }
 0x11a   : > { %v601_v11 = vadd.f32 %v600_v9, %v599_v7  ;;  %v1876_v7 = vld [vmem:[%s2416_s5 + $0x8] sm:$0xff]  }
 0x11b   : > { %v608_v13 = vadd.f32 %v607_v10, %v606_v8  ;;  %v1880_v8 = vld [vmem:[%s2415_s4] sm:$0xff]   ;;  %v1881_v9 = vld [vmem:[%s2415_s4 + $0x8] sm:$0xff]  }
 0x11c   : > { %v610_v14 = vmul.f32 0.0625, %v601_v11  ;;  %v857_v11 = vpop.permute.xlu0 %856 }
 0x11d   : > { %v611_v15 = vmul.f32 0.0625, %v608_v13 }
 0x11e   : > { %v612_v16 = vsub.f32 %v583_v58, %v610_v14  ;;  %v614_v17 = vsub.f32 %v587_v59, %v610_v14  ;;  %v862_v14 = vpop.permute.xlu1 %861 }
 0x11f   : > { %v613_v18 = vsub.f32 %v585_v61, %v611_v15  ;;  %v615_v19 = vsub.f32 %v589_v62, %v611_v15 }
 0x120   : > { %v616_v20 = vmul.f32 %v612_v16, %v612_v16  ;;  %v618_v21 = vmul.f32 %v614_v17, %v614_v17 }
 0x121   : > { %v617_v22 = vmul.f32 %v613_v18, %v613_v18  ;;  %v619_v23 = vmul.f32 %v615_v19, %v615_v19 }
 0x122   : > { %v620_v24 = vadd.f32 %v618_v21, %v616_v20 }
 0x123   : > { %v627_v25 = vadd.f32 %v619_v23, %v617_v22  ;;  %v867_v23 = vpop.permute.xlu0 %866 }
 0x124   : > { %v621_v26 = vrot.slane %v620_v24, 4 }
 0x125   : > { %v628_v27 = vrot.slane %v627_v25, 4 }
 0x126   : > { %v622_v28 = vadd.f32 %v621_v26, %v620_v24 }
 0x127   : > { %v629_v29 = vadd.f32 %v628_v27, %v627_v25  ;;  %v872_v27 = vpop.permute.xlu1 %871 }
 0x128   : > { %v623_v30 = vrot.slane %v622_v28, 2 }
 0x129   : > { %v630_v31 = vrot.slane %v629_v29, 2 }
 0x12a   : > { %v624_v32 = vadd.f32 %v623_v30, %v622_v28 }
 0x12b   : > { %v631_v33 = vadd.f32 %v630_v31, %v629_v29 }
 0x12c   : > { %v625_v34 = vrot.slane %v624_v32, 1 }
 0x12d   : > { %v632_v35 = vrot.slane %v631_v33, 1 }
 0x12e   : > { %v626_v36 = vadd.f32 %v625_v34, %v624_v32 }
 0x12f   : > { %v633_v37 = vadd.f32 %v632_v35, %v631_v33 }
 0x130   : > { %v634_v38 = vmul.f32 0.0625, %v626_v36 }
 0x131   : > { %v635_v39 = vmul.f32 0.0625, %v633_v37 }
 0x132   : > { %v636_v40 = vadd.f32 1e-05, %v634_v38 }
 0x133   : > { %v637_v41 = vadd.f32 1e-05, %v635_v39 }
 0x134   : > { %1891 = vrsqrt.f32 %v636_v40 }
 0x135   : > { %1893 = vrsqrt.f32 %v637_v41 }
 0x13e   : > { %v1892_v44 = vpop.eup %1891 }
 0x13f   : > { %v1894_v45 = vpop.eup %1893  ;;  %v642_v46 = vmul.f32 %v1892_v44, %v614_v17  ;;  %v640_v47 = vmul.f32 %v1892_v44, %v612_v16 }
 0x140   : > { %v643_v48 = vmul.f32 %v1894_v45, %v615_v19  ;;  %v641_v49 = vmul.f32 %v1894_v45, %v613_v18 }
 0x141   : > { %v654_v50 = vmul.f32 %v647_v42, %v640_v47  ;;  %v656_v51 = vmul.f32 %v652_v43, %v642_v46 }
 0x142   : > { %v655_v54 = vmul.f32 %v647_v42, %v641_v49  ;;  %v657_v55 = vmul.f32 %v652_v43, %v643_v48 }
 0x143   : > { %v668_v56 = vadd.f32 %v661_v52, %v654_v50  ;;  %v670_v57 = vadd.f32 %v666_v53, %v656_v51 }
 0x144   : > { %v669_v58 = vadd.f32 %v661_v52, %v655_v54  ;;  %v671_v59 = vadd.f32 %v666_v53, %v657_v55 }
 0x145   : > { %v672_v60 = vmax.f32 %v668_v56, 0.0  ;;  %v674_v61 = vmax.f32 %v670_v57, 0.0 }
 0x146   : > { %v673_v62 = vmax.f32 %v669_v58, 0.0  ;;  %v675_v63 = vmax.f32 %v671_v59, 0.0 }
 0x147   : > { %v684_v0 = vpack.c.bf16 %v674_v61, %v672_v60 }
 0x148   : > { %v685_v1 = vpack.c.bf16 %v675_v63, %v673_v62 }
 0x14a   : > { %707 = vmatprep.subr.bf16.mxu1 %v685_v1 }
 0x14b   : > { %708 = vmatpush1.bf16.msra.mxu1 %v684_v0 }
 0x14c   : > { %797 = vmatprep.subr.bf16.mxu1 %v1875_v2 }
 0x14e   : > { %1784 = vmatmul.mubr.msk.bf16.vlgmr.msra.gmra.mrb[0].mxu1 %vm700_vm2, %v1872_v3 }
 0x14f   : > { %798 = vmatpush1.bf16.msra.mxu1 %v1873_v4  ;;  %749 = vmatprep.mubr.bf16.mxu1 %v2003_v12 }
 0x150   : > { %799 = vmatprep.subr.bf16.mxu1 %v1879_v5 }
 0x153   : > { %800 = vmatpush1.bf16.msra.mxu1 %v1877_v6 }
 0x156   : > { %1785 = vmatmul.mubr.msk.bf16.gmra.mrb[4].mxu1 %vm700_vm2, %v1876_v7 }
 0x157   : > { %829 = vmatprep.mubr.bf16.mxu1 %v2003_v12 }
 0x15e   : > { %1792 = vmatmul.mubr.msk.bf16.vlgmr.msra.gmra.mrb[0].mxu1 %vm790_vm3, %v1880_v8 }
 0x15f   : > { %839 = vmatprep.mubr.bf16.mxu1 %v2003_v12 }
 0x166   : > { %1793 = vmatmul.mubr.msk.bf16.gmra.mrb[4].mxu1 %vm790_vm3, %v1881_v9 }
 0x167   : > { %1373 = vmatprep.mubr.bf16.mxu1 %v2003_v12 }
 0x231   : > { %v831_v10 = vpop.f32.mrb[0].mxu1 }
 0x232   : > { %v833_v13 = vpop.f32.mrb[1].mxu1  ;;  %v874_v16 = vadd.f32 %v857_v11, %v831_v10 }
 0x233   : > { %v835_v15 = vpop.f32.mrb[2].mxu1  ;;  %v875_v19 = vadd.f32 %v857_v11, %v833_v13 }
 0x234   : > { %v876_v17 = vadd.f32 %v862_v14, %v835_v15  ;;  %v837_v18 = vpop.f32.mrb[3].mxu1 }
 0x235   : > { %v877_v20 = vadd.f32 %v862_v14, %v837_v18 }
 0x236   : > { %v890_v21 = vadd.f32 %v876_v17, %v874_v16 }
 0x237   : > { %v899_v22 = vadd.f32 %v877_v20, %v875_v19 }
 0x239   : > { %v841_v24 = vpop.f32.mrb[4].mxu1 }
 0x23a   : > { %v878_v25 = vadd.f32 %v867_v23, %v841_v24  ;;  %v843_v26 = vpop.f32.mrb[5].mxu1 }
 0x23b   : > { %v879_v28 = vadd.f32 %v867_v23, %v843_v26  ;;  %v845_v29 = vpop.f32.mrb[6].mxu1  ;;  %v967_v23 = vpop.permute.xlu1 %966 }
 0x23c   : > { %v891_v30 = vadd.f32 %v890_v21, %v878_v25  ;;  %v880_v31 = vadd.f32 %v872_v27, %v845_v29  ;;  %v847_v32 = vpop.f32.mrb[7].mxu1 }
 0x23d   : > { %v900_v33 = vadd.f32 %v899_v22, %v879_v28  ;;  %v881_v34 = vadd.f32 %v872_v27, %v847_v32  ;;  %v962_v22 = vpop.permute.xlu0 %961 }
 0x23e   : > { %v892_v35 = vadd.f32 %v891_v30, %v880_v31 }
 0x23f   : > { %v901_v36 = vadd.f32 %v900_v33, %v881_v34  ;;  %v995_v29 = vpop.permute.xlu1 %994 }
 0x240   : > { %v893_v37 = vrot.slane %v892_v35, 4 }
 0x241   : > { %v902_v38 = vrot.slane %v901_v36, 4 }
 0x242   : > { %v894_v39 = vadd.f32 %v893_v37, %v892_v35 }
 0x243   : > { %v903_v40 = vadd.f32 %v902_v38, %v901_v36 }
 0x244   : > { %v895_v41 = vrot.slane %v894_v39, 2 }
 0x245   : > { %v904_v42 = vrot.slane %v903_v40, 2 }
 0x246   : > { %v896_v43 = vadd.f32 %v895_v41, %v894_v39 }
 0x247   : > { %v905_v44 = vadd.f32 %v904_v42, %v903_v40 }
 0x248   : > { %v897_v45 = vrot.slane %v896_v43, 1 }
 0x249   : > { %v906_v46 = vrot.slane %v905_v44, 1 }
 0x24a   : > { %v898_v47 = vadd.f32 %v897_v45, %v896_v43 }
 0x24b   : > { %v907_v48 = vadd.f32 %v906_v46, %v905_v44 }
 0x24c   : > { %v909_v49 = vmul.f32 0.03125, %v898_v47 }
 0x24d   : > { %v910_v50 = vmul.f32 0.03125, %v907_v48 }
 0x24e   : > { %v911_v51 = vsub.f32 %v874_v16, %v909_v49  ;;  %v913_v52 = vsub.f32 %v876_v17, %v909_v49  ;;  %v915_v53 = vsub.f32 %v878_v25, %v909_v49  ;;  %v917_v54 = vsub.f32 %v880_v31, %v909_v49  ;;  %v977_v31 = vpop.permute.xlu1 %976 }
 0x24f   : > { %v912_v55 = vsub.f32 %v875_v19, %v910_v50  ;;  %v914_v56 = vsub.f32 %v877_v20, %v910_v50  ;;  %v916_v57 = vsub.f32 %v879_v28, %v910_v50  ;;  %v918_v58 = vsub.f32 %v881_v34, %v910_v50  ;;  %v990_v28 = vpop.permute.xlu0 %989 }
 0x250   : > { %v919_v59 = vmul.f32 %v911_v51, %v911_v51  ;;  %v921_v60 = vmul.f32 %v913_v52, %v913_v52  ;;  %v923_v63 = vmul.f32 %v915_v53, %v915_v53  ;;  %v925_v3 = vmul.f32 %v917_v54, %v917_v54 }
 0x251   : > { %v920_v61 = vmul.f32 %v912_v55, %v912_v55  ;;  %v922_v62 = vmul.f32 %v914_v56, %v914_v56  ;;  %v924_v1 = vmul.f32 %v916_v57, %v916_v57  ;;  %v926_v5 = vmul.f32 %v918_v58, %v918_v58 }
 0x252   : > { %v927_v0 = vadd.f32 %v921_v60, %v919_v59  ;;  %v1005_v47 = vpop.permute.xlu1 %1004 }
 0x253   : > { %v936_v2 = vadd.f32 %v922_v62, %v920_v61  ;;  %v972_v30 = vpop.permute.xlu0 %971 }
 0x254   : > { %v928_v4 = vadd.f32 %v927_v0, %v923_v63 }
 0x255   : > { %v937_v6 = vadd.f32 %v936_v2, %v924_v1 }
 0x256   : > { %v929_v7 = vadd.f32 %v928_v4, %v925_v3 }
 0x257   : > { %v938_v8 = vadd.f32 %v937_v6, %v926_v5  ;;  %v1000_v46 = vpop.permute.xlu0 %999 }
 0x258   : > { %v930_v9 = vrot.slane %v929_v7, 4 }
 0x259   : > { %v939_v10 = vrot.slane %v938_v8, 4 }
 0x25a   : > { %v931_v11 = vadd.f32 %v930_v9, %v929_v7  ;;  %v2271_v9 = vld [vmem:[%s453_s29 + $0x18] sm:$0xff] }
 0x25b   : > { %v940_v13 = vadd.f32 %v939_v10, %v938_v8  ;;  %v2269_v8 = vld [vmem:[%s453_s29 + $0x8] sm:$0xff] }
 0x25c   : > { %v932_v14 = vrot.slane %v931_v11, 2  ;;  %v1036_v10 = vpack.c.bf16 %v2271_v9, %v2269_v8 }
 0x25d   : > { %v941_v15 = vrot.slane %v940_v13, 2 }
 0x25e   : > { %v933_v16 = vadd.f32 %v932_v14, %v931_v11  ;;  %v2275_v11 = vld [vmem:[%s453_s29] sm:$0xff]  ;;  %v2279_v14 = vld [vmem:[%s453_s29 + $0x28] sm:$0xff] }
 0x25f   : > { %v942_v17 = vadd.f32 %v941_v15, %v940_v13  ;;  %v2277_v13 = vld [vmem:[%s453_s29 + $0x10] sm:$0xff]  ;;  %v2281_v15 = vld [vmem:[%s453_s29 + $0x38] sm:$0xff] }
 0x260   : > { %v934_v18 = vrot.slane %v933_v16, 1 }
 0x261   : > { %v943_v19 = vrot.slane %v942_v17, 1 }
 0x262   : > { %v935_v20 = vadd.f32 %v934_v18, %v933_v16  ;;  %v1882_v16 = vld [vmem:[%s2418_s7] sm:$0xff]   ;;  %v1038_v18 = vpack.c.bf16 %v2281_v15, %v2279_v14 }
 0x263   : > { %v944_v21 = vadd.f32 %v943_v19, %v942_v17  ;;  %v1035_v17 = vpack.c.bf16 %v2277_v13, %v2275_v11  ;;  %v2290_v19 = vld [vmem:[%s453_s29 + $0x20] sm:$0xff] }
 0x264   : > { %v945_v24 = vmul.f32 0.03125, %v935_v20  ;;  %v2292_v20 = vld [vmem:[%s453_s29 + $0x30] sm:$0xff] }
 0x265   : > { %v946_v25 = vmul.f32 0.03125, %v944_v21  ;;  %v1037_v21 = vpack.c.bf16 %v2292_v20, %v2290_v19 }
 0x266   : > { %v947_v26 = vadd.f32 1e-05, %v945_v24  ;;  %v1885_v24 = vld [vmem:[%s2417_s6 + $0x8] sm:$0xff]  }
 0x267   : > { %v948_v27 = vadd.f32 1e-05, %v946_v25  ;;  %v1886_v25 = vld [vmem:[%s2417_s6 + $0x10] sm:$0xff]  }
 0x268   : > { %1895 = vrsqrt.f32 %v947_v26  ;;  %v1887_v26 = vld [vmem:[%s2417_s6 + $0x18] sm:$0xff]  }
 0x269   : > { %1897 = vrsqrt.f32 %v948_v27  ;;  %v1888_v27 = vld [vmem:[%s2419_s8] sm:$0xff]  }
 0x272   : > { %v1896_v32 = vpop.eup %1895 }
 0x273   : > { %v1898_v33 = vpop.eup %1897  ;;  %v957_v34 = vmul.f32 %v1896_v32, %v917_v54  ;;  %v951_v35 = vmul.f32 %v1896_v32, %v911_v51  ;;  %v953_v36 = vmul.f32 %v1896_v32, %v913_v52  ;;  %v955_v37 = vmul.f32 %v1896_v32, %v915_v53 }
 0x274   : > { %v958_v38 = vmul.f32 %v1898_v33, %v918_v58  ;;  %v952_v39 = vmul.f32 %v1898_v33, %v912_v55  ;;  %v954_v40 = vmul.f32 %v1898_v33, %v914_v56  ;;  %v956_v41 = vmul.f32 %v1898_v33, %v916_v57  ;;  %v1058_v33 = vpop.permute.xlu0 %1057 }
 0x275   : > { %v985_v42 = vmul.f32 %v977_v31, %v957_v34  ;;  %v979_v43 = vmul.f32 %v962_v22, %v951_v35  ;;  %v981_v44 = vmul.f32 %v967_v23, %v953_v36  ;;  %v983_v45 = vmul.f32 %v972_v30, %v955_v37  ;;  %v1063_v34 = vpop.permute.xlu1 %1062 }
 0x276   : > { %v986_v48 = vmul.f32 %v977_v31, %v958_v38  ;;  %v980_v49 = vmul.f32 %v962_v22, %v952_v39  ;;  %v982_v50 = vmul.f32 %v967_v23, %v954_v40  ;;  %v984_v59 = vmul.f32 %v972_v30, %v956_v41  ;;  %v1883_v22 = vld [vmem:[%s2417_s6] sm:$0xff]   ;;  %v1884_v23 = vld [vmem:[%s2418_s7 + $0x8] sm:$0xff]  }
 0x277   : > { %v1013_v54 = vadd.f32 %v1005_v47, %v985_v42  ;;  %v1007_v51 = vadd.f32 %v990_v28, %v979_v43  ;;  %v1009_v52 = vadd.f32 %v995_v29, %v981_v44  ;;  %v1011_v60 = vadd.f32 %v1000_v46, %v983_v45 }
 0x278   : > { %v1008_v53 = vadd.f32 %v990_v28, %v980_v49  ;;  %v1010_v58 = vadd.f32 %v995_v29, %v982_v50  ;;  %v1012_v55 = vadd.f32 %v1000_v46, %v984_v59  ;;  %v1014_v56 = vadd.f32 %v1005_v47, %v986_v48  ;;  %v1889_v28 = vld [vmem:[%s2419_s8 + $0x8] sm:$0xff]   ;;  %v1068_v46 = vpop.permute.xlu0 %1067 }
 0x279   : > { %v1021_v57 = vmax.f32 %v1013_v54, 0.0  ;;  %v1015_v61 = vmax.f32 %v1007_v51, 0.0  ;;  %v1017_v62 = vmax.f32 %v1009_v52, 0.0  ;;  %v1019_v63 = vmax.f32 %v1011_v60, 0.0  ;;  %v1073_v59 = vpop.permute.xlu1 %1072 }
 0x27a   : > { %v1016_v0 = vmax.f32 %v1008_v53, 0.0  ;;  %v1018_v1 = vmax.f32 %v1010_v58, 0.0  ;;  %v1020_v2 = vmax.f32 %v1012_v55, 0.0  ;;  %v1022_v3 = vmax.f32 %v1014_v56, 0.0 }
 0x27b   : > { %v1031_v4 = vpack.c.bf16 %v1017_v62, %v1015_v61  ;;  %v1033_v5 = vpack.c.bf16 %v1021_v57, %v1019_v63 }
 0x27c   : > { %v1032_v6 = vpack.c.bf16 %v1018_v1, %v1016_v0  ;;  %v1034_v7 = vpack.c.bf16 %v1022_v3, %v1020_v2  ;;  %v1078_v60 = vpop.permute.xlu0 %1077 }
 0x27d   : > { %v1083_v0 = vpop.permute.xlu1 %1082 }
 0x27e   : > { %1128 = vmatprep.subr.bf16.mxu0 %v1032_v6  ;;  %1341 = vmatprep.subr.bf16.mxu1 %v1032_v6 }
 0x27f   : > { %1129 = vmatpush1.bf16.msra.mxu0 %v1031_v4  ;;  %1342 = vmatpush1.bf16.msra.mxu1 %v1031_v4 }
 0x280   : > { %1130 = vmatprep.subr.bf16.mxu0 %v1034_v7  ;;  %1343 = vmatprep.subr.bf16.mxu1 %v1034_v7  ;;  %v1088_v4 = vpop.permute.xlu0 %1087 }
 0x283   : > { %1131 = vmatpush1.bf16.msra.mxu0 %v1033_v5  ;;  %1344 = vmatpush1.bf16.msra.mxu1 %v1033_v5 }
 0x284   : > { %1132 = vmatprep.subr.bf16.mxu0 %v1036_v10 }
 0x286   : > { %1820 = vmatmul.mubr.msk.bf16.vlgmr.msra.gmra.mrb[8].mxu1 %vm790_vm3, %v1882_v16 }
 0x287   : > { %1133 = vmatpush1.bf16.msra.mxu0 %v1035_v17  ;;  %1383 = vmatprep.mubr.bf16.mxu1 %v2003_v12 }
 0x288   : > { %1134 = vmatprep.subr.bf16.mxu0 %v1038_v18 }
 0x28b   : > { %1135 = vmatpush1.bf16.msra.mxu0 %v1037_v21 }
 0x28c   : > { %1438 = vmatprep.subr.bf16.mxu0 %v1036_v10 }
 0x28e   : > { %1798 = vmatmul.mubr.msk.bf16.vlgmr.msra.gmra.mrb[4].mxu0 %vm1115_vm4, %v1883_v22  ;;  %1821 = vmatmul.mubr.msk.bf16.gmra.mrb[12].mxu1 %vm790_vm3, %v1884_v23 }
 0x28f   : > { %1439 = vmatpush1.bf16.msra.mxu0 %v1035_v17  ;;  %1170 = vmatprep.mubr.bf16.mxu0 %v2003_v12 }
 0x290   : > { %1440 = vmatprep.subr.bf16.mxu0 %v1038_v18  ;;  %1605 = vmatprep.mubr.bf16.mxu1 %v2003_v12 }
 0x293   : > { %1441 = vmatpush1.bf16.msra.mxu0 %v1037_v21 }
 0x296   : > { %1799 = vmatmul.mubr.msk.bf16.gmra.mrb[8].mxu0 %vm1115_vm4, %v1885_v24 }
 0x297   : > { %1180 = vmatprep.mubr.bf16.mxu0 %v2003_v12 }
 0x29e   : > { %1800 = vmatmul.mubr.msk.bf16.gmra.mrb[12].mxu0 %vm1115_vm4, %v1886_v25 }
 0x29f   : > { %1190 = vmatprep.mubr.bf16.mxu0 %v2003_v12 }
 0x2a6   : > { %1801 = vmatmul.mubr.msk.bf16.gmra.mrb[16].mxu0 %vm1115_vm4, %v1887_v26 }
 0x2a7   : > { %1470 = vmatprep.mubr.bf16.mxu0 %v2003_v12 }
 0x2ae   : > { %1824 = vmatmul.mubr.msk.bf16.vlgmr.msra.gmra.mrb[20].mxu0 %vm790_vm3, %v1888_v27  ;;  %v1093_v27 = vpop.permute.xlu1 %1092 }
 0x2af   : > { %1480 = vmatprep.mubr.bf16.mxu0 %v2003_v12 }
 0x2b6   : > { %1825 = vmatmul.mubr.msk.bf16.gmra.mrb[24].mxu0 %vm790_vm3, %v1889_v28 }
 0x359   : > { %v2332_v29 = vpop.f32.mrb[8].mxu1 }
 0x35a   : > { %v2334_v30 = vpop.f32.mrb[9].mxu1 }
 0x35b   : > { %v2336_v31 = vpop.f32.mrb[10].mxu1 }
 0x35c   : > { %v2338_v32 = vpop.f32.mrb[11].mxu1 }
 0x361   : > { %v1162_v35 = vpop.f32.mrb[4].mxu0  ;;  %v2340_v36 = vpop.f32.mrb[12].mxu1 }
 0x362   : > { %v1163_v12 = vadd.f32 %v1162_v35, %v1058_v33  ;;  %v1164_v37 = vpop.f32.mrb[5].mxu0  ;;  %v2342_v38 = vpop.f32.mrb[13].mxu1 }
 0x363   : > { %v1165_v39 = vadd.f32 %v1164_v37, %v1058_v33  ;;  %v1166_v40 = vpop.f32.mrb[6].mxu0  ;;  %v2344_v41 = vpop.f32.mrb[14].mxu1 }
 0x364   : > { %v1802_v42 = vmul.f32 -1.442695, %v1163_v12  ;;  %v1167_v43 = vadd.f32 %v1166_v40, %v1063_v34  ;;  %v1168_v44 = vpop.f32.mrb[7].mxu0  ;;  %v2346_v45 = vpop.f32.mrb[15].mxu1 }
 0x365   : > { %v1803_v47 = vmul.f32 -1.442695, %v1165_v39  ;;  %v1169_v48 = vadd.f32 %v1168_v44, %v1063_v34  ;;  %v1405_v35 = vpop.permute.xlu0 %1404 }
 0x366   : > { %1899 = vpow2.f32 %v1802_v42  ;;  %v1804_v49 = vmul.f32 -1.442695, %v1167_v43 }
 0x367   : > { %1901 = vpow2.f32 %v1803_v47  ;;  %v1805_v50 = vmul.f32 -1.442695, %v1169_v48 }
 0x368   : > { %1903 = vpow2.f32 %v1804_v49  ;;  %v1410_v49 = vpop.permute.xlu1 %1409 }
 0x369   : > { %v1172_v54 = vpop.f32.mrb[8].mxu0  ;;  %1905 = vpow2.f32 %v1805_v50 }
 0x36a   : > { %v1173_v51 = vadd.f32 %v1172_v54, %v1068_v46  ;;  %v1174_v52 = vpop.f32.mrb[9].mxu0 }
 0x36b   : > { %v1175_v53 = vadd.f32 %v1174_v52, %v1068_v46  ;;  %v1176_v58 = vpop.f32.mrb[10].mxu0 }
 0x36c   : > { %v1806_v55 = vmul.f32 -1.442695, %v1173_v51  ;;  %v1177_v56 = vadd.f32 %v1176_v58, %v1073_v59  ;;  %v1178_v57 = vpop.f32.mrb[11].mxu0  ;;  %v1308_v58 = vpop.permute.xlu0 %1307 }
 0x36d   : > { %v1807_v61 = vmul.f32 -1.442695, %v1175_v53  ;;  %v1179_v62 = vadd.f32 %v1178_v57, %v1073_v59 }
 0x36e   : > { %1907 = vpow2.f32 %v1806_v55  ;;  %v1808_v63 = vmul.f32 -1.442695, %v1177_v56 }
 0x36f   : > { %1909 = vpow2.f32 %v1807_v61  ;;  %v1809_v1 = vmul.f32 -1.442695, %v1179_v62 }
 0x370   : > { %v1900_v2 = vpop.eup %1899  ;;  %1911 = vpow2.f32 %v1808_v63 }
 0x371   : > { %v1902_v3 = vpop.eup %1901  ;;  %v1225_v5 = vadd.f32 1.0, %v1900_v2  ;;  %v1182_v6 = vpop.f32.mrb[12].mxu0  ;;  %1913 = vpow2.f32 %v1809_v1 }
 0x372   : > { %v1904_v7 = vpop.eup %1903  ;;  %v1226_v10 = vadd.f32 1.0, %v1902_v3  ;;  %v1183_v16 = vadd.f32 %v1182_v6, %v1078_v60  ;;  %v1184_v17 = vpop.f32.mrb[13].mxu0  ;;  %v1376_v6 = vadd.f32 %v2332_v29, %v1308_v58 }
 0x373   : > { %v1227_v18 = vadd.f32 1.0, %v1904_v7  ;;  %v1185_v21 = vadd.f32 %v1184_v17, %v1078_v60  ;;  %v1186_v22 = vpop.f32.mrb[14].mxu0  ;;  %v1906_v23 = vpop.eup %1905  ;;  %1915 = vrcp.f32 %v1225_v5 }
 0x374   : > { %v1810_v24 = vmul.f32 -1.442695, %v1183_v16  ;;  %v1187_v25 = vadd.f32 %v1186_v22, %v1083_v0  ;;  %v1188_v26 = vpop.f32.mrb[15].mxu0  ;;  %1917 = vrcp.f32 %v1226_v10  ;;  %v1228_v12 = vadd.f32 1.0, %v1906_v23  ;;  %v1313_v3 = vpop.permute.xlu1 %1312 }
 0x375   : > { %v1811_v28 = vmul.f32 -1.442695, %v1185_v21  ;;  %v1189_v33 = vadd.f32 %v1188_v26, %v1083_v0  ;;  %1919 = vrcp.f32 %v1227_v18  ;;  %v1415_v18 = vpop.permute.xlu0 %1414  ;;  %v1378_v21 = vadd.f32 %v2334_v30, %v1308_v58 }
 0x376   : > { %v1812_v34 = vmul.f32 -1.442695, %v1187_v25  ;;  %1921 = vpow2.f32 %v1810_v24 }
 0x377   : > { %v1813_v37 = vmul.f32 -1.442695, %v1189_v33  ;;  %1923 = vpow2.f32 %v1811_v28 }
 0x378   : > { %v1908_v39 = vpop.eup %1907  ;;  %1925 = vpow2.f32 %v1812_v34 }
 0x379   : > { %v1910_v40 = vpop.eup %1909  ;;  %v1229_v42 = vadd.f32 1.0, %v1908_v39  ;;  %v1192_v43 = vpop.f32.mrb[16].mxu0  ;;  %1927 = vpow2.f32 %v1813_v37 }
 0x37a   : > { %v1912_v44 = vpop.eup %1911  ;;  %v1230_v46 = vadd.f32 1.0, %v1910_v40  ;;  %v1193_v47 = vadd.f32 %v1192_v43, %v1088_v4  ;;  %v1194_v48 = vpop.f32.mrb[17].mxu0  ;;  %1929 = vrcp.f32 %v1228_v12  ;;  %v1380_v40 = vadd.f32 %v2336_v31, %v1313_v3 }
 0x37b   : > { %v1231_v50 = vadd.f32 1.0, %v1912_v44  ;;  %v1195_v59 = vadd.f32 %v1194_v48, %v1088_v4  ;;  %v1196_v54 = vpop.f32.mrb[18].mxu0  ;;  %v1914_v51 = vpop.eup %1913  ;;  %1931 = vrcp.f32 %v1229_v42  ;;  %v1382_v44 = vadd.f32 %v2338_v32, %v1313_v3 }
 0x37c   : > { %v1814_v52 = vmul.f32 -1.442695, %v1193_v47  ;;  %v1197_v60 = vadd.f32 %v1196_v54, %v1093_v27  ;;  %v1198_v53 = vpop.f32.mrb[19].mxu0  ;;  %1933 = vrcp.f32 %v1230_v46  ;;  %v1232_v63 = vadd.f32 1.0, %v1914_v51  ;;  %v1318_v54 = vpop.permute.xlu0 %1317 }
 0x37d   : > { %v1815_v55 = vmul.f32 -1.442695, %v1195_v59  ;;  %v1199_v56 = vadd.f32 %v1198_v53, %v1093_v27  ;;  %v1916_v57 = vpop.eup %1915  ;;  %1935 = vrcp.f32 %v1231_v50  ;;  %v1386_v31 = vadd.f32 %v2340_v36, %v1318_v54 }
 0x37e   : > { %v1816_v61 = vmul.f32 -1.442695, %v1197_v60  ;;  %v1918_v62 = vpop.eup %1917  ;;  %1937 = vpow2.f32 %v1814_v52  ;;  %v1388_v32 = vadd.f32 %v2342_v38, %v1318_v54 }
 0x37f   : > { %v1817_v0 = vmul.f32 -1.442695, %v1199_v56  ;;  %v1920_v1 = vpop.eup %1919  ;;  %1939 = vpow2.f32 %v1815_v55 }
 0x380   : > { %v1922_v2 = vpop.eup %1921  ;;  %1941 = vpow2.f32 %v1816_v61 }
 0x381   : > { %v1472_v4 = vpop.f32.mrb[20].mxu0  ;;  %v1924_v5 = vpop.eup %1923  ;;  %v1273_v7 = vadd.f32 1.0, %v1922_v2  ;;  %1943 = vpow2.f32 %v1817_v0 }
 0x382   : > { %v1473_v10 = vadd.f32 %v1472_v4, %v1405_v35  ;;  %v1474_v16 = vpop.f32.mrb[21].mxu0  ;;  %v1926_v17 = vpop.eup %1925  ;;  %1945 = vrcp.f32 %v1232_v63  ;;  %v1274_v22 = vadd.f32 1.0, %v1924_v5 }
 0x383   : > { %v1475_v23 = vadd.f32 %v1474_v16, %v1405_v35  ;;  %v1476_v24 = vpop.f32.mrb[22].mxu0  ;;  %v1928_v25 = vpop.eup %1927  ;;  %1947 = vrcp.f32 %v1273_v7  ;;  %v1275_v26 = vadd.f32 1.0, %v1926_v17 }
 0x384   : > { %v1491_v27 = vmul.f32 %v1916_v57, %v1473_v10  ;;  %v1477_v28 = vadd.f32 %v1476_v24, %v1410_v49  ;;  %v1478_v33 = vpop.f32.mrb[23].mxu0  ;;  %v1930_v34 = vpop.eup %1929  ;;  %1949 = vrcp.f32 %v1274_v22  ;;  %v1276_v29 = vadd.f32 1.0, %v1928_v25 }
 0x385   : > { %v1492_v12 = vmul.f32 %v1918_v62, %v1475_v23  ;;  %v1479_v37 = vadd.f32 %v1478_v33, %v1410_v49  ;;  %v1932_v39 = vpop.eup %1931  ;;  %1951 = vrcp.f32 %v1275_v26  ;;  %v1420_v35 = vpop.permute.xlu1 %1419 }
 0x386   : > { %v1499_v30 = vadd.f32 %v1491_v27, %v1376_v6  ;;  %v1493_v42 = vmul.f32 %v1920_v1, %v1477_v28  ;;  %v1934_v43 = vpop.eup %1933  ;;  %1953 = vrcp.f32 %v1276_v29 }
 0x387   : > { %v1500_v46 = vadd.f32 %v1492_v12, %v1378_v21  ;;  %v1494_v47 = vmul.f32 %v1930_v34, %v1479_v37  ;;  %v1936_v48 = vpop.eup %1935 }
 0x388   : > { %1955 = vtanh.f32 %v1499_v30  ;;  %v1501_v50 = vadd.f32 %v1493_v42, %v1380_v40  ;;  %v1938_v59 = vpop.eup %1937 }
 0x389   : > { %1957 = vtanh.f32 %v1500_v46  ;;  %v1502_v49 = vadd.f32 %v1494_v47, %v1382_v44  ;;  %v1482_v51 = vpop.f32.mrb[24].mxu0  ;;  %v1940_v52 = vpop.eup %1939  ;;  %v1277_v60 = vadd.f32 1.0, %v1938_v59 }
 0x38a   : > { %1959 = vtanh.f32 %v1501_v50  ;;  %v1483_v53 = vadd.f32 %v1482_v51, %v1415_v18  ;;  %v1484_v58 = vpop.f32.mrb[25].mxu0  ;;  %v1942_v55 = vpop.eup %1941  ;;  %v1278_v56 = vadd.f32 1.0, %v1940_v52 }
 0x38b   : > { %1961 = vtanh.f32 %v1502_v49  ;;  %v1485_v57 = vadd.f32 %v1484_v58, %v1415_v18  ;;  %v1486_v61 = vpop.f32.mrb[26].mxu0  ;;  %v1944_v62 = vpop.eup %1943  ;;  %v1279_v63 = vadd.f32 1.0, %v1942_v55 }
 0x38c   : > { %1963 = vrcp.f32 %v1277_v60  ;;  %v1495_v0 = vmul.f32 %v1932_v39, %v1483_v53  ;;  %v1487_v1 = vadd.f32 %v1486_v61, %v1420_v35  ;;  %v1488_v2 = vpop.f32.mrb[27].mxu0  ;;  %v1946_v3 = vpop.eup %1945  ;;  %v1280_v36 = vadd.f32 1.0, %v1944_v62 }
 0x38d   : > { %v1323_v4 = vpop.permute.xlu1 %1322  ;;  %1965 = vrcp.f32 %v1278_v56  ;;  %v1496_v5 = vmul.f32 %v1934_v43, %v1485_v57  ;;  %v1489_v6 = vadd.f32 %v1488_v2, %v1420_v35  ;;  %v1948_v7 = vpop.eup %1947 }
 0x38e   : > { %v1390_v38 = vadd.f32 %v2344_v41, %v1323_v4  ;;  %1967 = vrcp.f32 %v1279_v63  ;;  %v1503_v10 = vadd.f32 %v1495_v0, %v1386_v31  ;;  %v1497_v16 = vmul.f32 %v1936_v48, %v1487_v1  ;;  %v1950_v17 = vpop.eup %1949 }
 0x38f   : > { %v1392_v18 = vadd.f32 %v2346_v45, %v1323_v4  ;;  %1969 = vrcp.f32 %v1280_v36  ;;  %v1504_v21 = vadd.f32 %v1496_v5, %v1388_v32  ;;  %v1498_v22 = vmul.f32 %v1946_v3, %v1489_v6  ;;  %v1952_v23 = vpop.eup %1951 }
 0x390   : > { %1971 = vtanh.f32 %v1503_v10  ;;  %v1505_v24 = vadd.f32 %v1497_v16, %v1390_v38  ;;  %v1954_v25 = vpop.eup %1953  ;;  %v1515_v27 = vsub.f32 1.0, %v1948_v7  ;;  %v1516_v41 = vsub.f32 1.0, %v1950_v17 }
 0x391   : > { %1973 = vtanh.f32 %v1504_v21  ;;  %v1506_v26 = vadd.f32 %v1498_v22, %v1392_v18  ;;  %v1517_v34 = vsub.f32 1.0, %v1952_v23  ;;  %v1531_v45 = vmul.f32 %v1948_v7, %v2275_v11  ;;  %v1563_v38 = vpop.permute.xlu1 %1562 }
 0x392   : > { %v1956_v28 = vpop.eup %1955  ;;  %1975 = vtanh.f32 %v1505_v24  ;;  %v1518_v37 = vsub.f32 1.0, %v1954_v25  ;;  %v1532_v40 = vmul.f32 %v1950_v17, %v2269_v8  ;;  %v1533_v43 = vmul.f32 %v1952_v23, %v2277_v13 }
 0x393   : > { %v1958_v33 = vpop.eup %1957  ;;  %1977 = vtanh.f32 %v1506_v26  ;;  %v1523_v29 = vmul.f32 %v1956_v28, %v1515_v27  ;;  %v1534_v47 = vmul.f32 %v1954_v25, %v2271_v9 }
 0x394   : > { %v1960_v12 = vpop.eup %1959  ;;  %v1524_v39 = vmul.f32 %v1958_v33, %v1516_v41 }
 0x395   : > { %v1962_v30 = vpop.eup %1961  ;;  %v1525_v42 = vmul.f32 %v1960_v12, %v1517_v34  ;;  %v1539_v35 = vadd.f32 %v1531_v45, %v1523_v29 }
 0x396   : > { %v1964_v44 = vpop.eup %1963  ;;  %v1526_v46 = vmul.f32 %v1962_v30, %v1518_v37  ;;  %v1540_v48 = vadd.f32 %v1532_v40, %v1524_v39 }
 0x397   : > { %v1966_v50 = vpop.eup %1965  ;;  %v1541_v59 = vadd.f32 %v1533_v43, %v1525_v42  ;;  %1620 = vst [vmem:[%s2361_s25 + $0x20] sm:$0xff] %v1539_v35  ;;  %v1519_v49 = vsub.f32 1.0, %v1964_v44  ;;  %v1535_v58 = vmul.f32 %v1964_v44, %v2290_v19 }
 0x398   : > { %v1968_v8 = vpop.eup %1967  ;;  %v1542_v11 = vadd.f32 %v1534_v47, %v1526_v46  ;;  %1621 = vst [vmem:[%s2361_s25 + $0x28] sm:$0xff] %v1540_v48  ;;  %v1520_v9 = vsub.f32 1.0, %v1966_v50  ;;  %v1536_v57 = vmul.f32 %v1966_v50, %v2279_v14  ;;  %v1890_v14 = vld [vmem:[%s2420_s9] sm:$0xff]  }
 0x399   : > { %v1970_v54 = vpop.eup %1969  ;;  %v1547_v13 = vpack.c.bf16 %v1541_v59, %v1539_v35  ;;  %1622 = vst [vmem:[%s2361_s25 + $0x30] sm:$0xff] %v1541_v59  ;;  %v1521_v60 = vsub.f32 1.0, %v1968_v8  ;;  %v1537_v63 = vmul.f32 %v1968_v8, %v2292_v20 }
 0x39a   : > { %v1972_v51 = vpop.eup %1971  ;;  %v1548_v52 = vpack.c.bf16 %v1542_v11, %v1540_v48  ;;  %1623 = vst [vmem:[%s2361_s25 + $0x38] sm:$0xff] %v1542_v11  ;;  %v1522_v32 = vsub.f32 1.0, %v1970_v54  ;;  %v1538_v2 = vmul.f32 %v1970_v54, %v2281_v15  ;;  %v1558_v15 = vpop.permute.xlu0 %1557 }
 0x39b   : > { %v1974_v31 = vpop.eup %1973  ;;  %v1527_v53 = vmul.f32 %v1972_v51, %v1519_v49 }
 0x39c   : > { %v1976_v55 = vpop.eup %1975  ;;  %1573 = vmatprep.subr.bf16.mxu1 %v1548_v52  ;;  %v1528_v56 = vmul.f32 %v1974_v31, %v1520_v9 }
 0x39d   : > { %v1978_v61 = vpop.eup %1977  ;;  %1574 = vmatpush1.bf16.msra.mxu1 %v1547_v13  ;;  %v1529_v62 = vmul.f32 %v1976_v55, %v1521_v60  ;;  %v1543_v0 = vadd.f32 %v1535_v58, %v1527_v53 }
 0x39e   : > { %v1530_v1 = vmul.f32 %v1978_v61, %v1522_v32  ;;  %v1544_v3 = vadd.f32 %v1536_v57, %v1528_v56  ;;  %v1658_v26 = vld [vmem:[%s2361_s25 + $0x20] sm:$0xff] (%p2099_p5) }
 0x39f   : > { %v1545_v19 = vadd.f32 %v1537_v63, %v1529_v62  ;;  %1624 = vst [vmem:[%s2361_s25 + $0x40] sm:$0xff] %v1543_v0  ;;  %v1660_v27 = vld [vmem:[%s2361_s25 + $0x28] sm:$0xff] (%p2099_p5)  ;;  %1659 = vst [vmem:[%s1637_s23 + $0x80] sm:$0xff] (%p2099_p5), %v1658_v26 }
 0x3a0   : > { %v1546_v4 = vadd.f32 %v1538_v2, %v1530_v1  ;;  %1625 = vst [vmem:[%s2361_s25 + $0x48] sm:$0xff] %v1544_v3  ;;  %1661 = vst [vmem:[%s1637_s23 + $0x88] sm:$0xff] (%p2099_p5), %v1660_v27  ;;  %v1662_v28 = vld [vmem:[%s2361_s25 + $0x30] sm:$0xff] (%p2099_p5) }
 0x3a1   : > { %v1549_v36 = vpack.c.bf16 %v1545_v19, %v1543_v0  ;;  %1626 = vst [vmem:[%s2361_s25 + $0x50] sm:$0xff] %v1545_v19  ;;  %v1664_v41 = vld [vmem:[%s2361_s25 + $0x38] sm:$0xff] (%p2099_p5)  ;;  %1663 = vst [vmem:[%s1637_s23 + $0xc0] sm:$0xff] (%p2099_p5), %v1662_v28 }
 0x3a2   : > { %v1550_v5 = vpack.c.bf16 %v1546_v4, %v1544_v3  ;;  %1627 = vst [vmem:[%s2361_s25 + $0x58] sm:$0xff] %v1546_v4  ;;  %1665 = vst [vmem:[%s1637_s23 + $0xc8] sm:$0xff] (%p2099_p5), %v1664_v41 }
 0x3a4   : > { %1575 = vmatprep.subr.bf16.mxu1 %v1550_v5 }
 0x3a5   : > { %1576 = vmatpush1.bf16.msra.mxu1 %v1549_v36 }
 0x3a6   : > { %v1666_v33 = vld [vmem:[%s2361_s25 + $0x40] sm:$0xff] (%p2099_p5) }
 0x3a7   : > { %1667 = vst [vmem:[%s1637_s23 + $0x100] sm:$0xff] (%p2099_p5), %v1666_v33  ;;  %v1668_v34 = vld [vmem:[%s2361_s25 + $0x48] sm:$0xff] (%p2099_p5) }
 0x3a8   : > { %1827 = vmatmul.mubr.msk.bf16.vlgmr.msra.gmra.mrb[16].mxu1 %vm790_vm3, %v1890_v14  ;;  %v1670_v29 = vld [vmem:[%s2361_s25 + $0x50] sm:$0xff] (%p2099_p5)  ;;  %1669 = vst [vmem:[%s1637_s23 + $0x108] sm:$0xff] (%p2099_p5), %v1668_v34 }
 0x3a9   : > { %v1672_v45 = vld [vmem:[%s2361_s25 + $0x58] sm:$0xff] (%p2099_p5)  ;;  %1671 = vst [vmem:[%s1637_s23 + $0x140] sm:$0xff] (%p2099_p5), %v1670_v29 }
 0x3aa   : > { %1673 = vst [vmem:[%s1637_s23 + $0x148] sm:$0xff] (%p2099_p5), %v1672_v45 }
 0x47b   : > { %v1607_v20 = vpop.f32.mrb[16].mxu1  ;;  %1634 = sbr.rel (!%p2099_p5) target bundleno = 1162 (0x48a), region = 129 }
 0x47c   : > { %v1608_v6 = vadd.f32 %v1607_v20, %v1558_v15  ;;  %v1609_v7 = vpop.f32.mrb[17].mxu1 }
 0x47d   : > { %v1610_v10 = vadd.f32 %v1609_v7, %v1558_v15  ;;  %v1611_v16 = vpop.f32.mrb[18].mxu1 }
 0x47e   : > { %1616 = vst [vmem:[%s2361_s25] sm:$0xff] %v1608_v6  ;;  %v1612_v17 = vadd.f32 %v1611_v16, %v1563_v38  ;;  %v1613_v18 = vpop.f32.mrb[19].mxu1 }
 0x47f   : > { %1617 = vst [vmem:[%s2361_s25 + $0x8] sm:$0xff] %v1610_v10  ;;  %v1614_v21 = vadd.f32 %v1613_v18, %v1563_v38 }
 0x480   : > { %1618 = vst [vmem:[%s2361_s25 + $0x10] sm:$0xff] %v1612_v17 }
 0x481   : > { %1619 = vst [vmem:[%s2361_s25 + $0x18] sm:$0xff] %v1614_v21 }
 0x485   : > { %v1650_v22 = vld [vmem:[%s2361_s25] sm:$0xff] }
 0x486   : > { %v1652_v23 = vld [vmem:[%s2361_s25 + $0x8] sm:$0xff]  ;;  %1651 = vst [vmem:[%s1637_s23] sm:$0xff] %v1650_v22 }
 0x487   : > { %v1654_v24 = vld [vmem:[%s2361_s25 + $0x10] sm:$0xff]  ;;  %1653 = vst [vmem:[%s1637_s23 + $0x8] sm:$0xff] %v1652_v23 }
 0x488   : > { %v1656_v25 = vld [vmem:[%s2361_s25 + $0x18] sm:$0xff]  ;;  %1655 = vst [vmem:[%s1637_s23 + $0x40] sm:$0xff] %v1654_v24 }
 0x489   : > { %1657 = vst [vmem:[%s1637_s23 + $0x48] sm:$0xff] %v1656_v25 }
 0x48a PF: > { %p18_p11 = scmp.ge.s32.totalorder %s2083_s21, 6   ;;  %s2425_s17 = smov %s1997_s18 }
 0x48b   : > { %s2426_s18 = smov %s2093_s24  ;;  %s2427_s19 = smov %s2083_s21 }
 0x48c   :  { %20 = sbr.rel (!%p18_p11) target bundleno = 2 (0x2), region = 194 }

</bundles_post_ra>
